<compile_context>
chip_gen: v6e
topology: v6e:2x2x1
jax: 0.10.0
libtpu: 0.0.40
codegen_flags: <defaults>
</compile_context>

<pallas_src>
import math

import jax
import jax.numpy as jnp
from jax import lax
from jax.experimental import pallas as pl
from jax.experimental.pallas import tpu as pltpu


def _round_up(x, m):
    return ((x + m - 1) // m) * m


def _make_conv_kernel(W, K, Cin, tile_h, precision):
    """Per-(halo row tile) conv kernel body (W, K, Cin, tile_h static)."""
    kkc = K * K * Cin

    def conv_kernel(xp_ref, w_ref, b_ref, o_ref):
        # xp_ref : (1, tile_h + K - 1, Wp, Cin)   halo row tile (mxu dtype)
        # w_ref  : (K*K*Cin, Cot)                 im2col weights (mxu dtype)
        # b_ref  : (1, Cot)                       bias (f32)
        # o_ref  : (1, tile_h, W, Cot)            conv output tile (f32)
        parts = []
        for ky in range(K):
            for kx in range(K):
                parts.append(xp_ref[0, pl.ds(ky, tile_h), pl.ds(kx, W), :])
        # TODO(synk): if a bundle dump shows the K*K-way lane concat (XLU/VALU)
        # binding on v6e/v7x, pre-pack the kx taps along channels in the wrapper
        # (lane width K*Cin) so only the ky concat remains in-kernel.
        lhs = jnp.concatenate(parts, axis=-1)            # (tile_h, W, K*K*Cin)
        lhs2 = lhs.reshape(tile_h * W, kkc)

        # Single MXU matmul: contraction K*K*Cin, output lanes = Cout*s*s.
        acc = jnp.dot(lhs2, w_ref[...],
                      preferred_element_type=jnp.float32,
                      precision=precision)
        acc = acc + b_ref[...]                           # (1, Cot) broadcast

        cot = o_ref.shape[-1]
        o_ref[0] = acc.reshape(tile_h, W, cot).astype(o_ref.dtype)

    return conv_kernel


def _pick_tile_h(H, W, Wp, Cin, Cot, K, budget_bytes, operand_bytes,
                 target_rows=1024):
    """Largest row tile whose REAL per-step working set fits `budget_bytes`.

    Working set = 2x double-buffered halo input block + 2x weights
                + 2x double-buffered f32 output block
                + materialized im2col lhs + f32 matmul result.
    Prefers multiples of 8; targets roughly `target_rows` MXU rows per tile.
    """
    def working_set(th):
        halo = (th + K - 1) * Wp * Cin * operand_bytes
        wmat = K * K * Cin * Cot * operand_bytes
        outb = th * W * Cot * 4
        lhs = th * W * K * K * Cin * operand_bytes
        acc = th * W * Cot * 4
        return 2 * halo + 2 * wmat + 2 * outb + lhs + acc

    hi = min(H, max(8, _round_up(max(1, -(-target_rows // W)), 8)))
    cands = [t for t in range(hi, 0, -1) if t % 8 == 0 or t == hi]
    cands += [t for t in range(hi, 0, -1) if t not in cands]
    for th in cands:
        if working_set(th) <= budget_bytes:
            return th
    # TODO(synk): also tile the W axis for images so wide that even tile_h=1
    # exceeds the VMEM budget.
    return 1


def pixel_shuffle_pack_pallas(x_nchw, weight, bias, scale_factor, upsample_kernel,
                              *, mxu_dtype=jnp.bfloat16):
    """PixelShufflePack forward: Conv2d(Cin->Cout*s*s, K, pad=(K-1)//2) + pixel_shuffle(s).

    Args:
      x_nchw: (N, Cin, H, W) float32
      weight: (Cout*s*s, Cin, K, K) float32   (PyTorch Conv2d layout)
      bias:   (Cout*s*s,) float32
      scale_factor: int s
      upsample_kernel: int K (odd)
      mxu_dtype: matmul operand dtype. bf16 (default) is MXU-native on
        v5e/v6e/v7x and halves input-side VMEM/HBM; jnp.float32 runs the matmul
        at Precision.HIGHEST for bit-faithfulness at MXU cost.
    Returns:
      (N, Cout, H*s, W*s) float32
    """
    N, Cin, H, W = x_nchw.shape
    K = int(upsample_kernel)
    s = int(scale_factor)
    Cot = weight.shape[0]                  # Cout * s * s
    assert Cot % (s * s) == 0
    Cout = Cot // (s * s)
    # TODO(synk): even K changes the conv output spatial size (H-1, W-1) in the
    # PyTorch module; only odd K (the module's intended use) is supported.
    assert K % 2 == 1, "upsample_kernel must be odd"
    pad = (K - 1) // 2
    Hp, Wp = H + 2 * pad, W + 2 * pad

    operand_bytes = jnp.dtype(mxu_dtype).itemsize
    precision = (lax.Precision.HIGHEST
                 if jnp.dtype(mxu_dtype) == jnp.dtype(jnp.float32) else None)

    # ---- generation-aware VMEM budget ---------------------------------------
    try:
        vmem_cap = int(pltpu.get_tpu_info().vmem_capacity_bytes)  # 64 MiB v7x, 128 MiB v5e/v6e
    except Exception:
        vmem_cap = 64 << 20                                       # conservative fallback
    vmem_limit = min((vmem_cap * 3) // 4, 100 << 20)
    tile_budget = max(vmem_limit - (4 << 20), 8 << 20)

    tile_h = _pick_tile_h(H, W, Wp, Cin, Cot, K, tile_budget, operand_bytes)
    n_tiles = -(-H // tile_h)              # ceil-div: no H-divisor requirement
    th_halo = tile_h + K - 1
    G = N * n_tiles

    # ---- input-side layout glue (cheap: Cin << Cot) --------------------------
    # NCHW -> NHWC (channels on the lane / contraction dim), zero pad, MXU cast.
    x_nhwc = jnp.transpose(x_nchw, (0, 2, 3, 1))
    x_pad = jnp.pad(x_nhwc, ((0, 0), (pad, pad), (pad, pad), (0, 0))).astype(mxu_dtype)

    # Overlapping halo row tiles: (G, tile_h+K-1, Wp, Cin). Costs only
    # ~(1+(K-1)/tile_h)x extra input HBM but removes whole-image VMEM residency
    # and gives the pipeline a per-tile input DMA.
    starts = jnp.arange(n_tiles, dtype=jnp.int32) * tile_h
    row_idx = jnp.clip(
        starts[:, None] + jnp.arange(th_halo, dtype=jnp.int32)[None, :], 0, Hp - 1)
    x_tiles = x_pad[:, row_idx].reshape(G, th_halo, Wp, Cin)

    # (Cot, Cin, K, K) -> (K*K*Cin, Cot): row index (ky*K + kx)*Cin + cin,
    # matching the in-kernel concatenation order of the shifted views.
    w_mat = jnp.transpose(weight, (2, 3, 1, 0)).reshape(K * K * Cin, Cot).astype(mxu_dtype)
    b2 = bias.reshape(1, Cot).astype(jnp.float32)

    kernel = _make_conv_kernel(W, K, Cin, tile_h, precision)

    flops = 2 * G * tile_h * W * Cot * K * K * Cin
    bytes_accessed = (x_tiles.size * operand_bytes + w_mat.size * operand_bytes
                      + b2.size * 4 + G * tile_h * W * Cot * 4)

    conv_out = pl.pallas_call(
        kernel,
        out_shape=jax.ShapeDtypeStruct((G, tile_h, W, Cot), jnp.float32),
        grid_spec=pltpu.PrefetchScalarGridSpec(
            num_scalar_prefetch=0,
            grid=(G,),
            in_specs=[
                # Per-grid-step halo row tile.
                pl.BlockSpec((1, th_halo, Wp, Cin), lambda g: (g, 0, 0, 0)),
                # Grid-invariant weights / bias (DMA'd once).
                pl.BlockSpec((K * K * Cin, Cot), lambda g: (0, 0)),
                pl.BlockSpec((1, Cot), lambda g: (0, 0)),
            ],
            out_specs=pl.BlockSpec((1, tile_h, W, Cot), lambda g: (g, 0, 0, 0)),
        ),
        compiler_params=pltpu.CompilerParams(
            # Independent (image, row-tile) work items flattened on one axis:
            # sharded across the two TensorCores on v7x; neutral on v5e/v6e.
            dimension_semantics=("parallel",),
            vmem_limit_bytes=int(vmem_limit),
        ),
        cost_estimate=pl.CostEstimate(flops=int(flops), transcendentals=0,
                                      bytes_accessed=int(bytes_accessed)),
    )(x_tiles, w_mat, b2)

    # Drop row padding, then pixel_shuffle + NHWC->NCHW as ONE fused transpose:
    #   out[n, c, h*s + i, w*s + j] = conv[n, h, w, c*s*s + i*s + j]
    # TODO(synk): if downstream can consume NHWC (or bf16) activations, emit
    # (N, H*s, W*s, Cout) and skip this output-sized HBM pass entirely.
    conv_out = conv_out.reshape(N, n_tiles * tile_h, W, Cot)[:, :H]
    y = conv_out.reshape(N, H, W, Cout, s, s)
    y = jnp.transpose(y, (0, 3, 1, 4, 2, 5))
    return y.reshape(N, Cout, H * s, W * s)


def _reference_forward(x_nchw, weight, bias, s, K):
    """Pure-JAX reference (lax conv at HIGHEST precision + pixel shuffle)."""
    pad = (K - 1) // 2
    conv = lax.conv_general_dilated(
        x_nchw, weight,
        window_strides=(1, 1),
        padding=((pad, pad), (pad, pad)),
        dimension_numbers=("NCHW", "OIHW", "NCHW"),
        precision=lax.Precision.HIGHEST,
    ) + bias.reshape(1, -1, 1, 1)
    N, Cot, H, W = conv.shape
    Cout = Cot // (s * s)
    y = conv.reshape(N, Cout, s, s, H, W)
    y = jnp.transpose(y, (0, 1, 4, 2, 5, 3))
    return y.reshape(N, Cout, H * s, W * s)


if __name__ == "__main__":
    # Small shapes consistent with the module.
    N, Cin, H, W = 2, 4, 16, 16
    Cout, s, K = 8, 2, 3
    Cot = Cout * s * s

    key = jax.random.PRNGKey(0)
    kx, kw = jax.random.split(key)

    x = jax.random.normal(kx, (N, Cin, H, W), dtype=jnp.float32)

    # Deterministic Kaiming-normal init (a=0, mode='fan_in', relu), bias = 0,
    # matching default_init_weights(scale=1).
    fan_in = Cin * K * K
    std = math.sqrt(2.0) / math.sqrt(fan_in)
    weight = jax.random.normal(kw, (Cot, Cin, K, K), dtype=jnp.float32) * std
    bias = jnp.zeros((Cot,), dtype=jnp.float32)

    out = pixel_shuffle_pack_pallas(x, weight, bias, s, K)
    out = jax.block_until_ready(out)

    # Reference with operands rounded through bf16 (matching the kernel's
    # intentional MXU-operand cast), accumulated in f32.
    x_b = x.astype(jnp.bfloat16).astype(jnp.float32)
    w_b = weight.astype(jnp.bfloat16).astype(jnp.float32)
    ref = _reference_forward(x_b, w_b, bias, s, K)

    assert out.shape == (N, Cout, H * s, W * s), out.shape
    assert jnp.allclose(out, ref, atol=1e-3, rtol=1e-3), "mismatch vs reference"

    print("KERNEL_OK")
</pallas_src>

<mosaic_0001>
module attributes {stable_mosaic.version = 11 : i64} {
  func.func @conv_kernel(%arg0: i32, %arg1: memref<1x18x18x4xbf16, #tpu.memory_space<vmem>>, %arg2: memref<36x32xbf16, #tpu.memory_space<vmem>>, %arg3: memref<1x32xf32, #tpu.memory_space<vmem>>, %arg4: memref<1x16x16x32xf32, #tpu.memory_space<vmem>>) attributes {dimension_semantics = [#tpu.dimension_semantics<parallel>], iteration_bounds = array<i64: 2>, scalar_prefetch = 0 : i64, scratch_operands = 0 : i64, tpu.core_type = #tpu.core_type<tc>, window_params = [{transform_indices = @transform_0, window_bounds = array<i64: 1, 18, 18, 4>}, {pipeline_mode = #tpu.pipeline_mode<synchronous>, transform_indices = @transform_1, window_bounds = array<i64: 36, 32>}, {pipeline_mode = #tpu.pipeline_mode<synchronous>, transform_indices = @transform_2, window_bounds = array<i64: 1, 32>}, {transform_indices = @transform_3, window_bounds = array<i64: 1, 16, 16, 32>}]} {
    %c0 = arith.constant 0 : index
    %c0_0 = arith.constant 0 : index
    %c0_1 = arith.constant 0 : index
    %c0_2 = arith.constant 0 : index
    %0 = vector.load %arg1[%c0, %c0_0, %c0_1, %c0_2] : memref<1x18x18x4xbf16, #tpu.memory_space<vmem>>, vector<1x16x16x4xbf16>
    %1 = vector.shape_cast %0 : vector<1x16x16x4xbf16> to vector<16x16x4xbf16>
    %c0_3 = arith.constant 0 : index
    %c0_4 = arith.constant 0 : index
    %c1 = arith.constant 1 : index
    %c0_5 = arith.constant 0 : index
    %2 = vector.load %arg1[%c0_3, %c0_4, %c1, %c0_5] : memref<1x18x18x4xbf16, #tpu.memory_space<vmem>>, vector<1x16x16x4xbf16>
    %3 = vector.shape_cast %2 : vector<1x16x16x4xbf16> to vector<16x16x4xbf16>
    %c0_6 = arith.constant 0 : index
    %c0_7 = arith.constant 0 : index
    %c2 = arith.constant 2 : index
    %c0_8 = arith.constant 0 : index
    %4 = vector.load %arg1[%c0_6, %c0_7, %c2, %c0_8] : memref<1x18x18x4xbf16, #tpu.memory_space<vmem>>, vector<1x16x16x4xbf16>
    %5 = vector.shape_cast %4 : vector<1x16x16x4xbf16> to vector<16x16x4xbf16>
    %c0_9 = arith.constant 0 : index
    %c1_10 = arith.constant 1 : index
    %c0_11 = arith.constant 0 : index
    %c0_12 = arith.constant 0 : index
    %6 = vector.load %arg1[%c0_9, %c1_10, %c0_11, %c0_12] : memref<1x18x18x4xbf16, #tpu.memory_space<vmem>>, vector<1x16x16x4xbf16>
    %7 = vector.shape_cast %6 : vector<1x16x16x4xbf16> to vector<16x16x4xbf16>
    %c0_13 = arith.constant 0 : index
    %c1_14 = arith.constant 1 : index
    %c1_15 = arith.constant 1 : index
    %c0_16 = arith.constant 0 : index
    %8 = vector.load %arg1[%c0_13, %c1_14, %c1_15, %c0_16] : memref<1x18x18x4xbf16, #tpu.memory_space<vmem>>, vector<1x16x16x4xbf16>
    %9 = vector.shape_cast %8 : vector<1x16x16x4xbf16> to vector<16x16x4xbf16>
    %c0_17 = arith.constant 0 : index
    %c1_18 = arith.constant 1 : index
    %c2_19 = arith.constant 2 : index
    %c0_20 = arith.constant 0 : index
    %10 = vector.load %arg1[%c0_17, %c1_18, %c2_19, %c0_20] : memref<1x18x18x4xbf16, #tpu.memory_space<vmem>>, vector<1x16x16x4xbf16>
    %11 = vector.shape_cast %10 : vector<1x16x16x4xbf16> to vector<16x16x4xbf16>
    %c0_21 = arith.constant 0 : index
    %c2_22 = arith.constant 2 : index
    %c0_23 = arith.constant 0 : index
    %c0_24 = arith.constant 0 : index
    %12 = vector.load %arg1[%c0_21, %c2_22, %c0_23, %c0_24] : memref<1x18x18x4xbf16, #tpu.memory_space<vmem>>, vector<1x16x16x4xbf16>
    %13 = vector.shape_cast %12 : vector<1x16x16x4xbf16> to vector<16x16x4xbf16>
    %c0_25 = arith.constant 0 : index
    %c2_26 = arith.constant 2 : index
    %c1_27 = arith.constant 1 : index
    %c0_28 = arith.constant 0 : index
    %14 = vector.load %arg1[%c0_25, %c2_26, %c1_27, %c0_28] : memref<1x18x18x4xbf16, #tpu.memory_space<vmem>>, vector<1x16x16x4xbf16>
    %15 = vector.shape_cast %14 : vector<1x16x16x4xbf16> to vector<16x16x4xbf16>
    %c0_29 = arith.constant 0 : index
    %c2_30 = arith.constant 2 : index
    %c2_31 = arith.constant 2 : index
    %c0_32 = arith.constant 0 : index
    %16 = vector.load %arg1[%c0_29, %c2_30, %c2_31, %c0_32] : memref<1x18x18x4xbf16, #tpu.memory_space<vmem>>, vector<1x16x16x4xbf16>
    %17 = vector.shape_cast %16 : vector<1x16x16x4xbf16> to vector<16x16x4xbf16>
    %18 = tpu.concatenate %1, %3, %5, %7, %9, %11, %13, %15, %17 in 2 : vector<16x16x4xbf16>, vector<16x16x4xbf16>, vector<16x16x4xbf16>, vector<16x16x4xbf16>, vector<16x16x4xbf16>, vector<16x16x4xbf16>, vector<16x16x4xbf16>, vector<16x16x4xbf16>, vector<16x16x4xbf16> -> vector<16x16x36xbf16>
    %19 = vector.shape_cast %18 : vector<16x16x36xbf16> to vector<256x36xbf16>
    %c0_33 = arith.constant 0 : index
    %c0_34 = arith.constant 0 : index
    %20 = vector.load %arg2[%c0_33, %c0_34] : memref<36x32xbf16, #tpu.memory_space<vmem>>, vector<36x32xbf16>
    %cst = arith.constant dense<0.000000e+00> : vector<256x32xf32>
    %21 = tpu.matmul %19, %20, %cst {dimension_numbers = #tpu.dot_dimension_numbers<[1], [0], [0], [1], [0, 0, 1, 1], [], []>} : vector<256x36xbf16>, vector<36x32xbf16>, vector<256x32xf32> -> vector<256x32xf32>
    %c0_35 = arith.constant 0 : index
    %c0_36 = arith.constant 0 : index
    %22 = vector.load %arg3[%c0_35, %c0_36] : memref<1x32xf32, #tpu.memory_space<vmem>>, vector<1x32xf32>
    %23 = vector.broadcast %22 : vector<1x32xf32> to vector<256x32xf32>
    %24 = arith.addf %21, %23 : vector<256x32xf32>
    %25 = vector.shape_cast %24 : vector<256x32xf32> to vector<16x16x32xf32>
    %c0_37 = arith.constant 0 : index
    %c0_38 = arith.constant 0 : index
    %c0_39 = arith.constant 0 : index
    %c0_40 = arith.constant 0 : index
    %26 = vector.load %arg4[%c0_37, %c0_38, %c0_39, %c0_40] : memref<1x16x16x32xf32, #tpu.memory_space<vmem>>, vector<1x16x16x32xf32>
    %27 = vector.shape_cast %26 : vector<1x16x16x32xf32> to vector<16x16x32xf32>
    %28 = vector.shape_cast %25 : vector<16x16x32xf32> to vector<1x16x16x32xf32>
    tpu.vector_store %arg4[%c0_37, %c0_38, %c0_39, %c0_40], %28 {strides = array<i32>} : memref<1x16x16x32xf32, #tpu.memory_space<vmem>>, vector<1x16x16x32xf32>,
    return
  }
  func.func @transform_0(%arg0: i32) -> (i32, i32, i32, i32) {
    %c0_i32 = arith.constant 0 : i32
    %c0_i32_0 = arith.constant 0 : i32
    %c0_i32_1 = arith.constant 0 : i32
    %c0_i32_2 = arith.constant 0 : i32
    return %arg0, %c0_i32, %c0_i32_0, %c0_i32_1 : i32, i32, i32, i32
  }
  func.func @transform_1(%arg0: i32) -> (i32, i32) {
    %c0_i32 = arith.constant 0 : i32
    %c0_i32_0 = arith.constant 0 : i32
    %c0_i32_1 = arith.constant 0 : i32
    return %c0_i32, %c0_i32_0 : i32, i32
  }
  func.func @transform_2(%arg0: i32) -> (i32, i32) {
    %c0_i32 = arith.constant 0 : i32
    %c0_i32_0 = arith.constant 0 : i32
    %c0_i32_1 = arith.constant 0 : i32
    return %c0_i32, %c0_i32_0 : i32, i32
  }
  func.func @transform_3(%arg0: i32) -> (i32, i32, i32, i32) {
    %c0_i32 = arith.constant 0 : i32
    %c0_i32_0 = arith.constant 0 : i32
    %c0_i32_1 = arith.constant 0 : i32
    %c0_i32_2 = arith.constant 0 : i32
    return %arg0, %c0_i32, %c0_i32_0, %c0_i32_1 : i32, i32, i32, i32
  }
}

</mosaic_0001>

<bundles_post_ra>
// kernel: tpu_custom_call.1
= control target key start
LH: loop header
LB: loop body
LE: loop exit
PB: predicated region body
PF: predicated region fallthrough
CT: control target
= control target key end

     0   :  { %8 = vsyncpa [#allocation3], 0  ;;  %s4551_s0 = inlined_call_operand.vmem [shape: bf16[2,18,18,4], index: 0, kind: input, shape index: {}]   ;;  %s4552_s1 = inlined_call_operand.vmem [shape: bf16[36,32], index: 1, kind: input, shape index: {}]   ;;  %s4553_s2 = inlined_call_operand.vmem [shape: f32[1,32], index: 2, kind: input, shape index: {}]   ;;  %s4554_s3 = inlined_call_operand.hbm [shape: f32[2,16,16,32], index: 3, kind: output, shape index: {}]  }
   0x1   :  { %10 = vsyncpa [#allocation3 + $0x1], 0  ;;  %s3124_s12 = smov 0   ;;  %s3126_s13 = smov 0  }
   0x2   :  { %s3128_s14 = smov 0   ;;  %s3130_s15 = smov 0  }
   0x3 LB: > { %s3145_s16 = sadd.s32 4294967295, %s3092_s15   ;;  %s2467_s17 = sadd.s32 4294967294, %s3092_s15   ;;  %s3092_s15 = sphi %s3130_s15, %s4575_s15   ;;  %s3088_s14 = sphi %s3128_s14, %s4574_s14   ;;  %s3084_s13 = sphi %s3126_s13, %s4573_s13   ;;  %s3080_s12 = sphi %s3124_s12, %s4572_s12  }
   0x4   : > { %s3149_s18 = sadd.s32 1, %s3092_s15   ;;  %s91_s19 = sadd.s32 1, %s3088_s14 }
   0x5   : > { %s88_s20 = ssub.s32 %s3092_s15, %s3149_s18  ;;  %p101_p0 = scmp.ne.s32.totalorder %s3088_s14, %s3084_s13 }
   0x6   : > { %p89_p1 = scmp.eq.s32.totalorder %s88_s20, 0  ;;  %p102_p2 = scmp.eq.s32.totalorder %s3145_s16, 1 }
   0x7   : > { %p107_p3 = scmp.ne.s32.totalorder %s3084_s13, %s3080_s12  ;;  %p108_p4 = scmp.eq.s32.totalorder %s2467_s17, 1 }
   0x8   : > { %s3160_s21 = scalar_select %p89_p1, %s3088_s14, %s91_s19  }
   0x9   : > { %p3162_p5 = por %p102_p2, %p101_p0  ;;  %p3166_p6 = por %p108_p4, %p107_p3 }
   0xa   : > { %p2470_p7 = scmp.ge.s32.totalorder %s3092_s15, 1  ;;  %p140_p8 = scmp.lt.s32.totalorder %s3092_s15, 3 }
   0xc   : > { %p141_p9 = pnand %p2470_p7, %p140_p8 }
   0xe   : > { %144 = sbr.rel (%p141_p9) target bundleno = 615 (0x267), region = 32 }
  0x13   : > { %p164_p10 = scmp.lt.s32.totalorder %s3145_s16, 1  ;;  %s3094_s29 = smov 12   ;;  %vm765_vm0 = vcmask 1046528   ;;  %vm492_vm1 = vsmask.f32 7424  ;;  %vm2194_vm2 = vcmask 1041408  }
  0x14   : > { %s3095_s30 = smov 8   ;;  %s3096_s4 = smov 4   ;;  %vm1870_vm3 = vcmask 31744   ;;  %vm1903_vm4 = vcmask 64512   ;;  %vm1936_vm5 = vcmask 97280   ;;  %vm1969_vm6 = vcmask 130048  }
  0x15   : > { %s165_s24 = scalar_select %p164_p10, %s3145_s16, 1  ;;  %vm2002_vm7 = vcmask 162816   ;;  %vm2035_vm8 = vcmask 195584   ;;  %vm2068_vm9 = vcmask 228352   ;;  %vm2101_vm10 = vcmask 261120  }
  0x16   : > { %s3097_s5 = smov 16   ;;  %s3098_s6 = smov 20   ;;  %vm2161_vm11 = vcmask 293888  }
  0x17   : > { %s2836_s25 = smul.u32 216, %s165_s24  ;;  %s3099_s7 = smov 24  }
  0x18   : > { %s3100_s8 = smov 28   ;;  %s3101_s9 = smov 32  }
  0x19   : > { %s3177_s28 = scalar_lea.vmem %s4551_s0, %s2836_s25  ;;  %s161_s25 = sand.u32 1, %s3084_s13  }
  0x1a   : > { %v2489_v0 = vld [vmem:[%s3177_s28 + $0x6c] sm:$0xf]  ;;  %v3181_v1 = vld [vmem:[%s3177_s28 + $0x70] sm:$0xf]  ;;  %v187_v6 = vld [vmem:[%s3177_s28 + $0x64] sm:$0xf] }
  0x1b   : > { %v3184_v2 = vcombine.low %v2489_v0, %v3181_v1  ;;  %v2473_v3 = vld [vmem:[%s3177_s28 + $0xc] sm:$0xf]  ;;  %v3188_v4 = vld [vmem:[%s3177_s28 + $0x10] sm:$0xf]  ;;  %v226_v7 = vld [vmem:[%s3177_s28 + $0x60] sm:$0xe] }
  0x1c   : > { %v3191_v5 = vcombine.low %v2473_v3, %v3188_v4  ;;  %v3198_v8 = vld [vmem:[%s3177_s28 + $0x68] ss:$0 sps:$4 sm:$0x11]   ;;  %v2641_v9 = vcombine.low %v226_v7, %v187_v6  ;;  %v186_v10 = vld [vmem:[%s3177_s28 + $0x60] sm:$0xf]  ;;  %s2471_s26 = sshll.u32 %s161_s25, 8 }
  0x1d   : > { %942 = vrot.lane.b32.xlu1 %v3184_v2, %s3094_s29  ;;  %v1105_v11 = vshll.u32 %v3184_v2, 16  ;;  %v171_v12 = vld [vmem:[%s3177_s28 + $0x4] sm:$0xf]  ;;  %v791_v14 = vrot.slane %v3198_v8, 1  ;;  %v218_v15 = vld [vmem:[%s3177_s28] sm:$0xe]  ;;  %v3209_v18 = vcombine.low %v186_v10, %v187_v6 }
  0x1e   : > { %926 = vrot.lane.b32.xlu0 %v3191_v5, %s3094_s29  ;;  %v790_v13 = vrot.slane %v2641_v9, 1  ;;  %v170_v16 = vld [vmem:[%s3177_s28] sm:$0xf]  ;;  %v1009_v17 = vshll.u32 %v3191_v5, 16  ;;  %v2633_v20 = vcombine.low %v218_v15, %v171_v12  ;;  %v188_v21 = vld [vmem:[%s3177_s28 + $0x6c] sm:$0xf] }
  0x1f   : > { %v2892_v19 = vld [vmem:[%s3177_s28 + $0x8] ss:$0 sps:$4 sm:$0x11]   ;;  %v3214_v23 = vcombine.low %v170_v16, %v171_v12  ;;  %v189_v24 = vld [vmem:[%s3177_s28 + $0x70] sm:$0xf]  ;;  %v590_v30 = vshrl.u32 %v3209_v18, 16 }
  0x20   : > { %v792_v22 = vsel %vm765_vm0, %v790_v13, %v791_v14  ;;  %v227_v25 = vld [vmem:[%s3177_s28 + $0x6c] sm:$0xe]  ;;  %v766_v26 = vrot.slane %v2633_v20, 1  ;;  %v767_v27 = vrot.slane %v2892_v19, 1  ;;  %v3221_v31 = vcombine.low %v188_v21, %v189_v24  ;;  %v173_v33 = vld [vmem:[%s3177_s28 + $0x10] sm:$0xf] }
  0x21   : > { %830 = vrot.lane.b32.xlu1 %v792_v22, %s3095_s30  ;;  %v2896_v28 = vld [vmem:[%s3177_s28 + $0x74] ss:$0 sps:$4 sm:$0x11]   ;;  %v2642_v29 = vcombine.low %v227_v25, %v189_v24  ;;  %v172_v32 = vld [vmem:[%s3177_s28 + $0xc] sm:$0xf]  ;;  %v494_v41 = vshrl.u32 %v3214_v23, 16 }
  0x22   : > { %v768_v34 = vsel %vm765_vm0, %v766_v26, %v767_v27  ;;  %v794_v36 = vrot.slane %v2896_v28, 1  ;;  %v219_v37 = vld [vmem:[%s3177_s28 + $0xc] sm:$0xe]  ;;  %v3227_v38 = vcombine.low %v172_v32, %v173_v33  ;;  %v2899_v39 = vld [vmem:[%s3177_s28 + $0x14] ss:$0 sps:$4 sm:$0x11]  }
  0x23   : > { %v793_v35 = vrot.slane %v2642_v29, 1  ;;  %814 = vrot.lane.b32.xlu0 %v768_v34, %s3095_s30  ;;  %v2634_v40 = vcombine.low %v219_v37, %v173_v33  ;;  %v496_v42 = vshll.u32 %v3214_v23, 16  ;;  %v501_v43 = vshll.u32 %v2892_v19, 16  ;;  %v2491_v52 = vld [vmem:[%s3177_s28 + $0x78] sm:$0xf]  ;;  %s3102_s10 = smov [#allocation2]  }
  0x24   : > { %v506_v45 = vshrl.u32 %v3227_v38, 16  ;;  %v508_v46 = vshll.u32 %v3227_v38, 16  ;;  %v602_v47 = vshrl.u32 %v3221_v31, 16  ;;  %v770_v49 = vrot.slane %v2899_v39, 1  ;;  %v3241_v57 = vld [vmem:[%s3177_s28 + $0x7c] sm:$0xf] }
  0x25   : > { %v795_v44 = vsel %vm765_vm0, %v793_v35, %v794_v36  ;;  %v769_v48 = vrot.slane %v2634_v40, 1  ;;  %v513_v50 = vshll.u32 %v2899_v39, 16  ;;  %v498_v51 = vrot.slane %v496_v42, 1  ;;  %v2475_v62 = vld [vmem:[%s3177_s28 + $0x18] sm:$0xf]  ;;  %s3036_s11 = sshll.u32 %s3102_s10, 4  ;;  %s3037_s11 = int_to_ptr.vmem [resolvable:$false] %s3036_s11 }
  0x26   : > { %832 = vrot.lane.b32.xlu1 %v795_v44, %s3095_s30  ;;  %v510_v53 = vrot.slane %v508_v46, 1  ;;  %v503_v54 = vrot.slane %v501_v43, 1  ;;  %v604_v55 = vshll.u32 %v3221_v31, 16  ;;  %v609_v56 = vshll.u32 %v2896_v28, 16  ;;  %v3247_v63 = vld [vmem:[%s3177_s28 + $0x1c] sm:$0xf] }
  0x27   : > { %v771_v58 = vsel %vm765_vm0, %v769_v48, %v770_v49  ;;  %v515_v59 = vrot.slane %v513_v50, 1  ;;  %v499_v60 = vor.u32 %v498_v51, %v494_v41  ;;  %v592_v61 = vshll.u32 %v3209_v18, 16  ;;  %v3254_v13 = vld [vmem:[%s3177_s28 + $0x74] ss:$0 sps:$4 sm:$0x11]   ;;  %s3038_s17 = scalar_lea.vmem %s3037_s11, 8192 }
  0x28   : > { %816 = vrot.lane.b32.xlu0 %v771_v58, %s3095_s30  ;;  %v511_v0 = vor.u32 %v510_v53, %v506_v45  ;;  %v606_v3 = vrot.slane %v604_v55, 1  ;;  %v611_v6 = vrot.slane %v609_v56, 1  ;;  %v597_v7 = vshll.u32 %v3198_v8, 16  ;;  %v3259_v20 = vld [vmem:[%s3177_s28 + $0x14] ss:$0 sps:$4 sm:$0x11]  }
  0x29   : > { %v504_v9 = vsel %vm492_vm1, %v499_v60, %v503_v54  ;;  %v594_v10 = vrot.slane %v592_v61, 1  ;;  %v2658_v12 = vcombine.low %v2491_v52, %v3241_v57  ;;  %v2650_v19 = vcombine.low %v2475_v62, %v3247_v63  ;;  %v3266_v24 = vld [vmem:[%s3177_s28 + $0x80] ss:$0 sps:$4 sm:$0x11]   ;;  %v2529_v35 = vld [vmem:[%s3177_s28 + $0x6c] sm:$0xe] }
  0x2a   : > { %v516_v14 = vsel %vm492_vm1, %v511_v0, %v515_v59  ;;  %v607_v15 = vor.u32 %v606_v3, %v602_v47  ;;  %v599_v16 = vrot.slane %v597_v7, 1  ;;  %v1103_v21 = vshrl.u32 %v3184_v2, 16  ;;  %v2521_v43 = vld [vmem:[%s3177_s28 + $0xc] sm:$0xe]  ;;  %v2530_v45 = vld [vmem:[%s3177_s28 + $0x78] sm:$0xe] }
  0x2b   : > { %687 = vrot.lane.b32.xlu1 %v516_v14, %s3096_s4  ;;  %v595_v8 = vor.u32 %v594_v10, %v590_v30  ;;  %v1107_v22 = vrot.slane %v1105_v11, 1  ;;  %v1117_v26 = vshll.u32 %v2658_v12, 16  ;;  %v1110_v27 = vshll.u32 %v3254_v13, 16  ;;  %v3277_v11 = vld [vmem:[%s3177_s28 + $0x20] ss:$0 sps:$4 sm:$0x11]  }
  0x2c   : > { %685 = vrot.lane.b32.xlu0 %v504_v9, %s3096_s4  ;;  %v612_v25 = vsel %vm492_vm1, %v607_v15, %v611_v6  ;;  %v1007_v28 = vshrl.u32 %v3191_v5, 16  ;;  %v1021_v30 = vshll.u32 %v2650_v19, 16  ;;  %v1011_v32 = vrot.slane %v1009_v17, 1  ;;  %v2522_v50 = vld [vmem:[%s3177_s28 + $0x18] sm:$0xe] }
  0x2d   : > { %v600_v29 = vsel %vm492_vm1, %v595_v8, %v599_v16  ;;  %v1014_v2 = vshll.u32 %v3259_v20, 16  ;;  %v1108_v33 = vor.u32 %v1107_v22, %v1103_v21  ;;  %v1112_v34 = vrot.slane %v1110_v27, 1  ;;  %v2553_v55 = vld [vmem:[%s3177_s28 + $0x78] sm:$0xf]  ;;  %v3297_v56 = vld [vmem:[%s3177_s28 + $0x7c] sm:$0xf] }
  0x2e   : > { %v1012_v36 = vor.u32 %v1011_v32, %v1007_v28  ;;  %v1115_v37 = vshrl.u32 %v2658_v12, 16  ;;  %v1119_v39 = vrot.slane %v1117_v26, 1  ;;  %v1122_v5 = vshll.u32 %v3266_v24, 16  ;;  %v2537_v3 = vld [vmem:[%s3177_s28 + $0x18] sm:$0xf] }
  0x2f   : > { %703 = vrot.lane.b32.xlu1 %v612_v25, %s3096_s4  ;;  %v1016_v17 = vrot.slane %v1014_v2, 1  ;;  %v1019_v40 = vshrl.u32 %v2650_v19, 16  ;;  %v1023_v41 = vrot.slane %v1021_v30, 1  ;;  %v1026_v42 = vshll.u32 %v3277_v11, 16  ;;  %v3308_v6 = vld [vmem:[%s3177_s28 + $0x1c] sm:$0xf] }
  0x30   : > { %701 = vrot.lane.b32.xlu0 %v600_v29, %s3096_s4  ;;  %v2689_v44 = vcombine.low %v2529_v35, %v3181_v1  ;;  %v1113_v46 = vsel %vm492_vm1, %v1108_v33, %v1112_v34  ;;  %v1120_v47 = vor.u32 %v1119_v39, %v1115_v37  ;;  %v1124_v48 = vrot.slane %v1122_v5, 1  ;;  %v2539_v16 = vld [vmem:[%s3177_s28 + $0x24] sm:$0xf]  ;;  %v3328_v21 = vld [vmem:[%s3177_s28 + $0x80] ss:$0 sps:$4 sm:$0x11]  }
  0x31   : > { %v2681_v49 = vcombine.low %v2521_v43, %v3188_v4  ;;  %v1017_v51 = vsel %vm492_vm1, %v1012_v36, %v1016_v17  ;;  %v1024_v52 = vor.u32 %v1023_v41, %v1019_v40  ;;  %v1028_v53 = vrot.slane %v1026_v42, 1  ;;  %v3335_v27 = vld [vmem:[%s3177_s28 + $0x20] ss:$0 sps:$4 sm:$0x11]   ;;  %v190_v37 = vld [vmem:[%s3177_s28 + $0x78] sm:$0xf] }
  0x32   : > { %v1302_v1 = vrot.slane %v2689_v44, 1  ;;  %v1303_v54 = vrot.slane %v3254_v13, 1  ;;  %v2690_v58 = vcombine.low %v2530_v45, %v3241_v57  ;;  %v2682_v4 = vcombine.low %v2522_v50, %v3247_v63  ;;  %v2555_v63 = vld [vmem:[%s3177_s28 + $0x84] sm:$0xf]  ;;  %v3317_v13 = vld [vmem:[%s3177_s28 + $0x88] sm:$0xf] }
  0x33   : > { %944 = vrot.lane.b32.xlu1 %v2658_v12, %s3094_s29  ;;  %v1125_v59 = vsel %vm492_vm1, %v1120_v47, %v1124_v48  ;;  %v1029_v60 = vsel %vm492_vm1, %v1024_v52, %v1028_v53  ;;  %v1278_v61 = vrot.slane %v2681_v49, 1  ;;  %v1279_v62 = vrot.slane %v3259_v20, 1  ;;  %v3344_v34 = vld [vmem:[%s3177_s28 + $0x2c] ss:$0 sps:$4 sm:$0x11]  }
  0x34   : > { %928 = vrot.lane.b32.xlu0 %v2650_v19, %s3094_s29  ;;  %v2705_v0 = vcombine.low %v2553_v55, %v3297_v56  ;;  %v1304_v57 = vsel %vm765_vm0, %v1302_v1, %v1303_v54  ;;  %v1305_v7 = vrot.slane %v2690_v58, 1  ;;  %v1306_v9 = vrot.slane %v3266_v24, 1  ;;  %v3323_v19 = vld [vmem:[%s3177_s28 + $0x28] sm:$0xf]  ;;  %v3349_v39 = vld [vmem:[%s3177_s28 + $0x7c] sm:$0xf] }
  0x35   : > { %v1281_v10 = vrot.slane %v2682_v4, 1  ;;  %v1282_v12 = vrot.slane %v3277_v11, 1  ;;  %v1280_v14 = vsel %vm765_vm0, %v1278_v61, %v1279_v62  ;;  %v2697_v15 = vcombine.low %v2537_v3, %v3308_v6  ;;  %v3340_v11 = vld [vmem:[%s3177_s28 + $0x8c] ss:$0 sps:$4 sm:$0x11]  }
  0x36   : > { %v1617_v20 = vshll.u32 %v2705_v0, 16  ;;  %v2706_v8 = vcombine.low %v2555_v63, %v3317_v13  ;;  %v1307_v22 = vsel %vm765_vm0, %v1305_v7, %v1306_v9  ;;  %v2698_v24 = vcombine.low %v2539_v16, %v3323_v19  ;;  %v174_v17 = vld [vmem:[%s3177_s28 + $0x18] sm:$0xf]  ;;  %v3353_v40 = vld [vmem:[%s3177_s28 + $0x1c] sm:$0xf] }
  0x37   : > { %1214 = vrot.lane.b32.xlu1 %v1113_v46, %s3097_s5  ;;  %v1283_v25 = vsel %vm765_vm0, %v1281_v10, %v1282_v12  ;;  %v1521_v26 = vshll.u32 %v2697_v15, 16  ;;  %v1615_v28 = vshrl.u32 %v2705_v0, 16  ;;  %v1622_v32 = vshll.u32 %v3328_v21, 16  ;;  %v2593_v41 = vld [vmem:[%s3177_s28 + $0x78] sm:$0xe] }
  0x38   : > { %1198 = vrot.lane.b32.xlu0 %v1017_v51, %s3097_s5  ;;  %v1619_v29 = vrot.slane %v1617_v20, 1  ;;  %v1629_v30 = vshll.u32 %v2706_v8, 16  ;;  %v1519_v2 = vshrl.u32 %v2697_v15, 16  ;;  %v1533_v33 = vshll.u32 %v2698_v24, 16  ;;  %v2585_v46 = vld [vmem:[%s3177_s28 + $0x18] sm:$0xe] }
  0x39   : > { %v1523_v35 = vrot.slane %v1521_v26, 1  ;;  %v1526_v36 = vshll.u32 %v3335_v27, 16  ;;  %v1624_v42 = vrot.slane %v1622_v32, 1  ;;  %v1627_v43 = vshrl.u32 %v2706_v8, 16  ;;  %v176_v9 = vld [vmem:[%s3177_s28 + $0x24] sm:$0xf] }
  0x3a   : > { %v1620_v5 = vor.u32 %v1619_v29, %v1615_v28  ;;  %v1631_v44 = vrot.slane %v1629_v30, 1  ;;  %v1634_v45 = vshll.u32 %v3340_v11, 16  ;;  %v1531_v47 = vshrl.u32 %v2698_v24, 16  ;;  %v3371_v4 = vld [vmem:[%s3177_s28 + $0x80] ss:$0 sps:$4 sm:$0x11]  }
  0x3b   : > { %1216 = vrot.lane.b32.xlu1 %v1125_v59, %s3097_s5  ;;  %v1535_v48 = vrot.slane %v1533_v33, 1  ;;  %v1538_v49 = vshll.u32 %v3344_v34, 16  ;;  %v3362_v50 = vcombine.low %v190_v37, %v3349_v39  ;;  %v1524_v51 = vor.u32 %v1523_v35, %v1519_v2  ;;  %v3388_v10 = vld [vmem:[%s3177_s28 + $0x28] sm:$0xf]  ;;  %v2594_v12 = vld [vmem:[%s3177_s28 + $0x84] sm:$0xe] }
  0x3c   : > { %1200 = vrot.lane.b32.xlu0 %v1029_v60, %s3097_s5  ;;  %v1528_v52 = vrot.slane %v1526_v36, 1  ;;  %v3365_v53 = vcombine.low %v174_v17, %v3353_v40  ;;  %v2737_v1 = vcombine.low %v2593_v41, %v3297_v56  ;;  %v2729_v54 = vcombine.low %v2585_v46, %v3308_v6  ;;  %v3377_v56 = vld [vmem:[%s3177_s28 + $0x20] ss:$0 sps:$4 sm:$0x11]   ;;  %v192_v6 = vld [vmem:[%s3177_s28 + $0x84] sm:$0xf] }
  0x3d   : > { %v1632_v55 = vor.u32 %v1631_v44, %v1627_v43  ;;  %v1636_v58 = vrot.slane %v1634_v45, 1  ;;  %v1625_v59 = vsel %vm492_vm1, %v1620_v5, %v1624_v42  ;;  %v1536_v60 = vor.u32 %v1535_v48, %v1531_v47  ;;  %v3413_v36 = vld [vmem:[%s3177_s28 + $0x8c] ss:$0 sps:$4 sm:$0x11]  }
  0x3e   : > { %v1540_v61 = vrot.slane %v1538_v49, 1  ;;  %v616_v62 = vshll.u32 %v3362_v50, 16  ;;  %v520_v3 = vshll.u32 %v3365_v53, 16  ;;  %v1814_v63 = vrot.slane %v2737_v1, 1 }
  0x3f   : > { %1342 = vrot.lane.b32.xlu1 %v1304_v57, %s3098_s6  ;;  %v3383_v57 = vld [vmem:[%s3177_s28 + $0x88] sm:$0xf]  ;;  %v1815_v7 = vrot.slane %v3328_v21, 1  ;;  %v1791_v16 = vrot.slane %v3335_v27, 1  ;;  %v621_v20 = vshll.u32 %v3371_v4, 16  ;;  %v518_v26 = vshrl.u32 %v3365_v53, 16 }
  0x40   : > { %1326 = vrot.lane.b32.xlu0 %v1280_v14, %s3098_s6  ;;  %v1637_v14 = vsel %vm492_vm1, %v1632_v55, %v1636_v58  ;;  %v1541_v21 = vsel %vm492_vm1, %v1536_v60, %v1540_v61  ;;  %v522_v28 = vrot.slane %v520_v3, 1  ;;  %v525_v27 = vshll.u32 %v3377_v56, 16 }
  0x41   : > { %v3405_v29 = vcombine.low %v176_v9, %v3388_v10  ;;  %v2738_v30 = vcombine.low %v2594_v12, %v3317_v13  ;;  %v623_v2 = vrot.slane %v621_v20, 1  ;;  %v1816_v33 = vsel %vm765_vm0, %v1814_v63, %v1815_v7  ;;  %v3418_v13 = vld [vmem:[%s3177_s28 + $0x2c] ss:$0 sps:$4 sm:$0x11]   ;;  %v221_v63 = vld [vmem:[%s3177_s28 + $0x24] sm:$0xe] }
  0x42   : > { %v523_v17 = vor.u32 %v522_v28, %v518_v26  ;;  %v527_v41 = vrot.slane %v525_v27, 1  ;;  %v1818_v43 = vrot.slane %v3340_v11, 1  ;;  %v1794_v45 = vrot.slane %v3344_v34, 1  ;;  %v220_v34 = vld [vmem:[%s3177_s28 + $0x18] sm:$0xe] }
  0x43   : > { %1344 = vrot.lane.b32.xlu1 %v1307_v22, %s3098_s6  ;;  %v614_v22 = vshrl.u32 %v3362_v50, 16  ;;  %4562 = vst [vmem:[#allocation5_spill] sm:$0xff] %v3405_v29  ;;  %v1817_v42 = vrot.slane %v2738_v30, 1  ;;  %v633_v49 = vshll.u32 %v3413_v36, 16  ;;  %v530_v1 = vshrl.u32 %v3405_v29, 16 }
  0x44   : > { %1328 = vrot.lane.b32.xlu0 %v1283_v25, %s3098_s6  ;;  %v3400_v25 = vcombine.low %v192_v6, %v3383_v57  ;;  %v2635_v61 = vcombine.low %v220_v34, %v3353_v40  ;;  %v797_v7 = vrot.slane %v3371_v4, 1  ;;  %v773_v9 = vrot.slane %v3377_v56, 1  ;;  %v2477_v56 = vld [vmem:[%s3177_s28 + $0x24] sm:$0xf]  ;;  %v2495_v28 = vld [vmem:[%s3177_s28 + $0x90] sm:$0xf] }
  0x45   : > { %v1819_v55 = vsel %vm765_vm0, %v1817_v42, %v1818_v43  ;;  %v2636_v4 = vcombine.low %v221_v63, %v3388_v10  ;;  %v3465_v10 = vld [vmem:[%s3177_s28 + $0x94] sm:$0xf] }
  0x46   : > { %v628_v37 = vshll.u32 %v3400_v25, 16  ;;  %v626_v47 = vshrl.u32 %v3400_v25, 16 }
  0x47   : > { %1454 = vrot.lane.b32.xlu1 %v2705_v0, %s3099_s7  ;;  %v1529_v0 = vsel %vm492_vm1, %v1524_v51, %v1528_v52  ;;  %v228_v51 = vld [vmem:[%s3177_s28 + $0x78] sm:$0xe]  ;;  %v528_v52 = vsel %vm492_vm1, %v523_v17, %v527_v41  ;;  %v775_v30 = vrot.slane %v2636_v4, 1  ;;  %v3479_v41 = vld [vmem:[%s3177_s28 + $0x8c] ss:$0 sps:$4 sm:$0x11]  }
  0x48   : > { %1438 = vrot.lane.b32.xlu0 %v2697_v15, %s3099_s7  ;;  %v1790_v15 = vrot.slane %v2729_v54, 1  ;;  %v630_v48 = vrot.slane %v628_v37, 1  ;;  %v537_v54 = vshll.u32 %v3418_v13, 16  ;;  %v2643_v60 = vcombine.low %v228_v51, %v3349_v39  ;;  %v2524_v4 = vld [vmem:[%s3177_s28 + $0x30] sm:$0xe] }
  0x4a   : > { %v1792_v5 = vsel %vm765_vm0, %v1790_v15, %v1791_v16  ;;  %v631_v58 = vor.u32 %v630_v48, %v626_v47  ;;  %v539_v6 = vrot.slane %v537_v54, 1  ;;  %v796_v40 = vrot.slane %v2643_v60, 1  ;;  %v2493_v15 = vld [vmem:[%s3177_s28 + $0x84] sm:$0xf]  ;;  %v3449_v16 = vld [vmem:[%s3177_s28 + $0x88] sm:$0xf] }
  0x4b   : > { %1456 = vrot.lane.b32.xlu1 %v2706_v8, %s3099_s7  ;;  %v2586_v8 = vld [vmem:[%s3177_s28 + $0x24] sm:$0xe]  ;;  %v1134_v47 = vshll.u32 %v3479_v41, 16 }
  0x4c   : > { %1440 = vrot.lane.b32.xlu0 %v2698_v24, %s3099_s7  ;;  %v618_v24 = vrot.slane %v616_v62, 1  ;;  %v2730_v32 = vcombine.low %v2586_v8, %v3323_v19  ;;  %v532_v19 = vshll.u32 %v3405_v29, 16  ;;  %v229_v62 = vld [vmem:[%s3177_s28 + $0x84] sm:$0xe]  ;;  %v3455_v8 = vld [vmem:[%s3177_s28 + $0x28] sm:$0xf] }
  0x4d   : > { %v2644_v12 = vcombine.low %v229_v62, %v3383_v57  ;;  %v2651_v26 = vcombine.low %v2477_v56, %v3455_v8  ;;  %v1136_v54 = vrot.slane %v1134_v47, 1  ;;  %v2981_v47 = vld [vmem:[%s4552_s1 + $0x10] ss:$0 sps:$4 sm:$0x33]   ;;  %v182_v29 = vld [vmem:[%s3177_s28 + $0x48] sm:$0xf] }
  0x4e   : > { %v619_v35 = vor.u32 %v618_v24, %v614_v22  ;;  %v1793_v44 = vrot.slane %v2730_v32, 1  ;;  %v534_v11 = vrot.slane %v532_v19, 1  ;;  %v2659_v22 = vcombine.low %v2493_v15, %v3449_v16  ;;  %v3483_v19 = vld [vmem:[%s3177_s28 + $0x2c] ss:$0 sps:$4 sm:$0x11]   ;;  %2834 = vmatprep.subr.msk.bf16.mxu0 %vm2194_vm2, %v2981_v47  ;;  %2835 = vmatprep.subr.msk.bf16.mxu1 %vm2194_vm2, %v2981_v47 }
  0x4f   : > { %1726 = vrot.lane.b32.xlu1 %v1625_v59, %s3100_s8  ;;  %v635_v59 = vrot.slane %v633_v49, 1  ;;  %v799_v57 = vrot.slane %v2644_v12, 1  ;;  %v798_v24 = vsel %vm765_vm0, %v796_v40, %v797_v7  ;;  %v776_v32 = vrot.slane %v3418_v13, 1  ;;  %v3489_v49 = vld [vmem:[%s3177_s28 + $0x98] ss:$0 sps:$4 sm:$0x11]  }
  0x50   : > { %1710 = vrot.lane.b32.xlu0 %v1529_v0, %s3100_s8  ;;  %v624_v46 = vsel %vm492_vm1, %v619_v35, %v623_v2  ;;  %v1795_v0 = vsel %vm765_vm0, %v1793_v44, %v1794_v45  ;;  %v535_v3 = vor.u32 %v534_v11, %v530_v1  ;;  %v2479_v2 = vld [vmem:[%s3177_s28 + $0x30] sm:$0xf]  ;;  %v1129_v35 = vshll.u32 %v2659_v22, 16 }
  0x51   : > { %v636_v39 = vsel %vm492_vm1, %v631_v58, %v635_v59  ;;  %v777_v13 = vsel %vm765_vm0, %v775_v30, %v776_v32  ;;  %v1127_v43 = vshrl.u32 %v2659_v22, 16  ;;  %v1031_v45 = vshrl.u32 %v2651_v26, 16  ;;  %v2531_v59 = vld [vmem:[%s3177_s28 + $0x84] sm:$0xe]  ;;  %v2541_v30 = vld [vmem:[%s3177_s28 + $0x30] sm:$0xf] }
  0x52   : > { %v540_v20 = vsel %vm492_vm1, %v535_v3, %v539_v6  ;;  %v1131_v44 = vrot.slane %v1129_v35, 1  ;;  %v1038_v51 = vshll.u32 %v3483_v19, 16  ;;  %v1146_v58 = vshll.u32 %v3489_v49, 16  ;;  %v2523_v3 = vld [vmem:[%s3177_s28 + $0x24] sm:$0xe] }
  0x53   : > { %1728 = vrot.lane.b32.xlu1 %v1637_v14, %s3100_s8  ;;  %v772_v14 = vrot.slane %v2635_v61, 1  ;;  %v2532_v6 = vld [vmem:[%s3177_s28 + $0x90] sm:$0xe]  ;;  %v2691_v63 = vcombine.low %v2531_v59, %v3449_v16  ;;  %v3524_v32 = vld [vmem:[%s3177_s28 + $0x34] sm:$0xf] }
  0x54   : > { %1712 = vrot.lane.b32.xlu0 %v1541_v21, %s3100_s8  ;;  %v800_v21 = vrot.slane %v3413_v36, 1  ;;  %v2660_v36 = vcombine.low %v2495_v28, %v3465_v10  ;;  %v1132_v1 = vor.u32 %v1131_v44, %v1127_v43  ;;  %v1040_v60 = vrot.slane %v1038_v51, 1  ;;  %v2559_v35 = vld [vmem:[%s3177_s28 + $0x9c] sm:$0xf] }
  0x55   : > { %v774_v27 = vsel %vm765_vm0, %v772_v14, %v773_v9  ;;  %v1148_v12 = vrot.slane %v1146_v58, 1  ;;  %v1308_v56 = vrot.slane %v2691_v63, 1  ;;  %v1285_v28 = vrot.slane %v3483_v19, 1  ;;  %v3554_v51 = vld [vmem:[%s3177_s28 + $0x38] ss:$0 sps:$4 sm:$0x11]  }
  0x56   : > { %v801_v37 = vsel %vm765_vm0, %v799_v57, %v800_v21  ;;  %v1141_v42 = vshll.u32 %v2660_v36, 16  ;;  %v1139_v11 = vshrl.u32 %v2660_v36, 16  ;;  %v1137_v7 = vsel %vm492_vm1, %v1132_v1, %v1136_v54  ;;  %v2557_v57 = vld [vmem:[%s3177_s28 + $0x90] sm:$0xf]  ;;  %v3516_v21 = vld [vmem:[%s3177_s28 + $0x94] sm:$0xf] }
  0x57   : > { %1854 = vrot.lane.b32.xlu1 %v1816_v33, %s3101_s9  ;;  %v3471_v33 = vld [vmem:[%s3177_s28 + $0x34] sm:$0xf]  ;;  %v2699_v19 = vcombine.low %v2541_v30, %v3524_v32  ;;  %v3557_v1 = vld [vmem:[%s3177_s28 + $0xa4] ss:$0 sps:$4 sm:$0x11]  }
  0x58   : > { %1838 = vrot.lane.b32.xlu0 %v1792_v5, %s3101_s9  ;;  %v1033_v5 = vshll.u32 %v2651_v26, 16  ;;  %v2652_v17 = vcombine.low %v2479_v2, %v3471_v33  ;;  %v2707_v2 = vcombine.low %v2557_v57, %v3516_v21  ;;  %v194_v63 = vld [vmem:[%s3177_s28 + $0x90] sm:$0xf] }
  0x5a   : > { %v1035_v48 = vrot.slane %v1033_v5, 1  ;;  %v1043_v61 = vshrl.u32 %v2652_v17, 16  ;;  %v3536_v5 = vld [vmem:[%s3177_s28 + $0x40] sm:$0xf]  ;;  %v1641_v43 = vshll.u32 %v2707_v2, 16 }
  0x5b   : > { %705 = vrot.lane.b32.xlu1 %v624_v46, %s3096_s4  ;;  %v1045_v46 = vshll.u32 %v2652_v17, 16 }
  0x5c   : > { %689 = vrot.lane.b32.xlu0 %v528_v52, %s3096_s4  ;;  %v3493_v52 = vld [vmem:[%s3177_s28 + $0x38] ss:$0 sps:$4 sm:$0x11]   ;;  %v1036_v34 = vor.u32 %v1035_v48, %v1031_v45  ;;  %v1643_v58 = vrot.slane %v1641_v43, 1 }
  0x5d   : > { %v1047_v62 = vrot.slane %v1045_v46, 1  ;;  %v3547_v46 = vld [vmem:[%s3177_s28 + $0x98] ss:$0 sps:$4 sm:$0x11]  }
  0x5e   : > { %v1041_v40 = vsel %vm492_vm1, %v1036_v34, %v1040_v60  ;;  %v1639_v34 = vshrl.u32 %v2707_v2, 16  ;;  %v1646_v59 = vshll.u32 %v3547_v46, 16  ;;  %v1543_v60 = vshrl.u32 %v2699_v19, 16 }
  0x5f   : > { %1856 = vrot.lane.b32.xlu1 %v1819_v55, %s3101_s9  ;;  %v1143_v55 = vrot.slane %v1141_v42, 1  ;;  %v1048_v14 = vor.u32 %v1047_v62, %v1043_v61  ;;  %v2196_v61 = vsel %vm2194_vm2, %v2981_v47, 0  ;;  %v2991_v62 = vld [vmem:[%s4552_s1] sm:$0xff]  }
  0x60   : > { %1840 = vrot.lane.b32.xlu0 %v1795_v0, %s3101_s9  ;;  %v1050_v0 = vshll.u32 %v3493_v52, 16  ;;  %2791 = vmatpush3.bf16.msra.mxu0 %v2196_v61  ;;  %v3615_v47 = vld [vmem:[%s3177_s28 + $0x40] sm:$0xf] }
  0x61   : > { %v1144_v9 = vor.u32 %v1143_v55, %v1139_v11  ;;  %v2986_v11 = vld [vmem:[%s4552_s1 + $0x8] sm:$0xff]   ;;  %v3564_v55 = vld [vmem:[%s3177_s28 + $0x44] ss:$0 sps:$4 sm:$0x11]   ;;  %2831 = vmatpush3.bf16.msra.mxu1 %v2196_v61 }
  0x62   : > { %v1052_v15 = vrot.slane %v1050_v0, 1  ;;  %v2595_v0 = vld [vmem:[%s3177_s28 + $0x90] sm:$0xe]  ;;  %2792 = vmatprep.subr.bf16.mxu0 %v2986_v11  ;;  %2829 = vmatprep.subr.bf16.mxu1 %v2986_v11 }
  0x63   : > { %707 = vrot.lane.b32.xlu1 %v636_v39, %s3096_s4  ;;  %v2683_v39 = vcombine.low %v2523_v3, %v3455_v8  ;;  %v1149_v16 = vsel %vm492_vm1, %v1144_v9, %v1148_v12  ;;  %v1309_v8 = vrot.slane %v3479_v41, 1  ;;  %v1658_v12 = vshll.u32 %v3557_v1, 16 }
  0x64   : > { %691 = vrot.lane.b32.xlu0 %v540_v20, %s3096_s4  ;;  %v2692_v20 = vcombine.low %v2532_v6, %v3465_v10  ;;  %v1550_v6 = vshll.u32 %v3554_v51, 16  ;;  %2793 = vmatpush3.bf16.msra.mxu0 %v2986_v11 }
  0x65   : > { %2832 = vmatpush3.bf16.msra.mxu1 %v2986_v11  ;;  %2794 = vmatprep.subr.bf16.mxu0 %v2991_v62 }
  0x66   : > { %v1311_v10 = vrot.slane %v2692_v20, 1  ;;  %2830 = vmatprep.subr.bf16.mxu1 %v2991_v62 }
  0x67   : > { %834 = vrot.lane.b32.xlu1 %v798_v24, %s3095_s30  ;;  %v1053_v24 = vsel %vm492_vm1, %v1048_v14, %v1052_v15 }
  0x68   : > { %818 = vrot.lane.b32.xlu0 %v774_v27, %s3095_s30  ;;  %v1312_v27 = vrot.slane %v3489_v49, 1  ;;  %v1545_v49 = vshll.u32 %v2699_v19, 16  ;;  %2795 = vmatpush3.bf16.msra.mxu0 %v2991_v62 }
  0x69   : > { %2833 = vmatpush3.bf16.msra.mxu1 %v2991_v62 }
  0x6a   : > { %v1313_v45 = vsel %vm765_vm0, %v1311_v10, %v1312_v27  ;;  %v1547_v3 = vrot.slane %v1545_v49, 1  ;;  %v1660_v10 = vrot.slane %v1658_v12, 1  ;;  %v3642_v12 = vld [vmem:[%s3177_s28 + $0xa4] ss:$0 sps:$4 sm:$0x11]  }
  0x6b   : > { %836 = vrot.lane.b32.xlu1 %v801_v37, %s3095_s30  ;;  %v2543_v37 = vld [vmem:[%s3177_s28 + $0x3c] sm:$0xf] }
  0x6c   : > { %820 = vrot.lane.b32.xlu0 %v777_v13, %s3095_s30  ;;  %v1288_v13 = vrot.slane %v3493_v52, 1  ;;  %v2700_v44 = vcombine.low %v2543_v37, %v3536_v5 }
  0x6e   : > { %v1557_v54 = vshll.u32 %v2700_v44, 16  ;;  %v1555_v15 = vshrl.u32 %v2700_v44, 16 }
  0x6f   : > { %946 = vrot.lane.b32.xlu1 %v2659_v22, %s3094_s29  ;;  %v2684_v22 = vcombine.low %v2524_v4, %v3471_v33  ;;  %v1310_v33 = vsel %vm765_vm0, %v1308_v56, %v1309_v8  ;;  %v1562_v4 = vshll.u32 %v3564_v55, 16  ;;  %v1644_v56 = vor.u32 %v1643_v58, %v1639_v34  ;;  %v2588_v58 = vld [vmem:[%s3177_s28 + $0x3c] sm:$0xe] }
  0x70   : > { %930 = vrot.lane.b32.xlu0 %v2651_v26, %s3094_s29  ;;  %v1284_v26 = vrot.slane %v2683_v39, 1  ;;  %v178_v39 = vld [vmem:[%s3177_s28 + $0x30] sm:$0xf]  ;;  %v1559_v20 = vrot.slane %v1557_v54, 1  ;;  %v1648_v8 = vrot.slane %v1646_v59, 1  ;;  %v1797_v34 = vrot.slane %v3554_v51, 1 }
  0x71   : > { %v1287_v41 = vrot.slane %v2684_v22, 1  ;;  %v1548_v22 = vor.u32 %v1547_v3, %v1543_v60 }
  0x73   : > { %948 = vrot.lane.b32.xlu1 %v2660_v36, %s3094_s29  ;;  %v3530_v36 = vld [vmem:[%s3177_s28 + $0xa0] sm:$0xf]  ;;  %v1289_v48 = vsel %vm765_vm0, %v1287_v41, %v1288_v13 }
  0x74   : > { %932 = vrot.lane.b32.xlu0 %v2652_v17, %s3094_s29  ;;  %v1286_v17 = vsel %vm765_vm0, %v1284_v26, %v1285_v28  ;;  %v2708_v42 = vcombine.low %v2559_v35, %v3530_v36  ;;  %v2739_v28 = vcombine.low %v2595_v0, %v3516_v21  ;;  %v1564_v35 = vrot.slane %v1562_v4, 1 }
  0x75   : > { %v1649_v21 = vsel %vm492_vm1, %v1644_v56, %v1648_v8  ;;  %v3651_v56 = vld [vmem:[%s3177_s28 + $0x44] ss:$0 sps:$4 sm:$0x11]  }
  0x76   : > { %v1653_v52 = vshll.u32 %v2708_v42, 16  ;;  %v1651_v9 = vshrl.u32 %v2708_v42, 16  ;;  %v1820_v43 = vrot.slane %v2739_v28, 1  ;;  %v1824_v28 = vrot.slane %v3557_v1, 1 }
  0x77   : > { %1218 = vrot.lane.b32.xlu1 %v1137_v7, %s3097_s5  ;;  %v3575_v7 = vld [vmem:[%s3177_s28 + $0x94] sm:$0xf] }
  0x78   : > { %1202 = vrot.lane.b32.xlu0 %v1041_v40, %s3097_s5  ;;  %v3580_v40 = vld [vmem:[%s3177_s28 + $0x34] sm:$0xf]  ;;  %v1655_v14 = vrot.slane %v1653_v52, 1  ;;  %v3587_v57 = vcombine.low %v194_v63, %v3575_v7 }
  0x79   : > { %v3590_v26 = vcombine.low %v178_v39, %v3580_v40 }
  0x7a   : > { %4563 = vst [vmem:[#allocation6_spill] sm:$0xff] %v3587_v57  ;;  %v1656_v30 = vor.u32 %v1655_v14, %v1651_v9  ;;  %v640_v37 = vshll.u32 %v3587_v57, 16  ;;  %v2732_v9 = vcombine.low %v2588_v58, %v3536_v5 }
  0x7b   : > { %1220 = vrot.lane.b32.xlu1 %v1149_v16, %s3097_s5  ;;  %v2587_v16 = vld [vmem:[%s3177_s28 + $0x30] sm:$0xe]  ;;  %4564 = vst [vmem:[#allocation7_spill] sm:$0xff] %v3590_v26  ;;  %v544_v13 = vshll.u32 %v3590_v26, 16  ;;  %v542_v62 = vshrl.u32 %v3590_v26, 16 }
  0x7c   : > { %1204 = vrot.lane.b32.xlu0 %v1053_v24, %s3097_s5  ;;  %v1552_v24 = vrot.slane %v1550_v6, 1  ;;  %v2731_v27 = vcombine.low %v2587_v16, %v3524_v32  ;;  %v1661_v52 = vsel %vm492_vm1, %v1656_v30, %v1660_v10  ;;  %v642_v59 = vrot.slane %v640_v37, 1  ;;  %v230_v37 = vld [vmem:[%s3177_s28 + $0x90] sm:$0xe] }
  0x7d   : > { %v546_v0 = vrot.slane %v544_v13, 1  ;;  %v1799_v10 = vrot.slane %v2732_v9, 1  ;;  %v657_v30 = vshll.u32 %v3642_v12, 16 }
  0x7e   : > { %v1553_v32 = vsel %vm492_vm1, %v1548_v22, %v1552_v24  ;;  %v1796_v54 = vrot.slane %v2731_v27, 1  ;;  %v1800_v27 = vrot.slane %v3564_v55, 1 }
  0x7f   : > { %1346 = vrot.lane.b32.xlu1 %v1310_v33, %s3098_s6  ;;  %v3596_v33 = vld [vmem:[%s3177_s28 + $0x98] ss:$0 sps:$4 sm:$0x11]   ;;  %v547_v16 = vor.u32 %v546_v0, %v542_v62  ;;  %v223_v62 = vld [vmem:[%s3177_s28 + $0x3c] sm:$0xe] }
  0x80   : > { %1330 = vrot.lane.b32.xlu0 %v1286_v17, %s3098_s6  ;;  %v3602_v17 = vld [vmem:[%s3177_s28 + $0x38] ss:$0 sps:$4 sm:$0x11]   ;;  %v645_v60 = vshll.u32 %v3596_v33, 16 }
  0x81   : > { %v549_v3 = vshll.u32 %v3602_v17, 16 }
  0x83   : > { %1348 = vrot.lane.b32.xlu1 %v1313_v45, %s3098_s6  ;;  %v180_v45 = vld [vmem:[%s3177_s28 + $0x3c] sm:$0xf]  ;;  %v551_v5 = vrot.slane %v549_v3, 1 }
  0x84   : > { %1332 = vrot.lane.b32.xlu0 %v1289_v48, %s3098_s6  ;;  %v2596_v48 = vld [vmem:[%s3177_s28 + $0x9c] sm:$0xe]  ;;  %v3634_v6 = vcombine.low %v180_v45, %v3615_v47 }
  0x85   : > { %v2740_v51 = vcombine.low %v2596_v48, %v3530_v36  ;;  %v1798_v36 = vsel %vm765_vm0, %v1796_v54, %v1797_v34  ;;  %v552_v13 = vsel %vm492_vm1, %v547_v16, %v551_v5  ;;  %v1801_v34 = vsel %vm765_vm0, %v1799_v10, %v1800_v27  ;;  %v2483_v27 = vld [vmem:[%s3177_s28 + $0x48] sm:$0xf] }
  0x86   : > { %4566 = vst [vmem:[#allocation9_spill] sm:$0xff] %v3634_v6  ;;  %v556_v8 = vshll.u32 %v3634_v6, 16  ;;  %v806_v10 = vrot.slane %v3642_v12, 1 }
  0x87   : > { %1458 = vrot.lane.b32.xlu1 %v2707_v2, %s3099_s7  ;;  %v1560_v2 = vor.u32 %v1559_v20, %v1555_v15  ;;  %v647_v15 = vrot.slane %v645_v60, 1  ;;  %v1823_v22 = vrot.slane %v2740_v51, 1  ;;  %v2497_v51 = vld [vmem:[%s3177_s28 + $0x9c] sm:$0xf] }
  0x88   : > { %1442 = vrot.lane.b32.xlu0 %v2699_v19, %s3099_s7  ;;  %v196_v19 = vld [vmem:[%s3177_s28 + $0x9c] sm:$0xf]  ;;  %v558_v1 = vrot.slane %v556_v8, 1  ;;  %v3706_v8 = vld [vmem:[%s3177_s28 + $0xac] sm:$0xf] }
  0x89   : > { %v1565_v11 = vsel %vm492_vm1, %v1560_v2, %v1564_v35  ;;  %v1825_v48 = vsel %vm765_vm0, %v1823_v22, %v1824_v28 }
  0x8b   : > { %1460 = vrot.lane.b32.xlu1 %v2708_v42, %s3099_s7  ;;  %v3610_v42 = vld [vmem:[%s3177_s28 + $0xa0] sm:$0xf] }
  0x8c   : > { %1444 = vrot.lane.b32.xlu0 %v2700_v44, %s3099_s7  ;;  %v1821_v44 = vrot.slane %v3547_v46, 1  ;;  %v638_v46 = vshrl.u32 %v3587_v57, 16  ;;  %v3629_v61 = vcombine.low %v196_v19, %v3610_v42  ;;  %v554_v19 = vshrl.u32 %v3634_v6, 16 }
  0x8e   : > { %4565 = vst [vmem:[#allocation8_spill] sm:$0xff] %v3629_v61  ;;  %v1822_v39 = vsel %vm765_vm0, %v1820_v43, %v1821_v44  ;;  %v643_v14 = vor.u32 %v642_v59, %v638_v46  ;;  %v652_v20 = vshll.u32 %v3629_v61, 16  ;;  %v650_v35 = vshrl.u32 %v3629_v61, 16  ;;  %v231_v59 = vld [vmem:[%s3177_s28 + $0x9c] sm:$0xe] }
  0x8f   : > { %v3605_v41 = vpop.permute.xlu1 %942  ;;  %1730 = vrot.lane.b32.xlu1 %v1649_v21, %s3100_s8  ;;  %v561_v43 = vshll.u32 %v3651_v56, 16  ;;  %v2645_v44 = vcombine.low %v230_v37, %v3575_v7  ;;  %v559_v58 = vor.u32 %v558_v1, %v554_v19  ;;  %v803_v7 = vrot.slane %v3596_v33, 1  ;;  %v2481_v33 = vld [vmem:[%s3177_s28 + $0x3c] sm:$0xf] }
  0x90   : > { %v3619_v49 = vpop.permute.xlu0 %926  ;;  %1714 = vrot.lane.b32.xlu0 %v1553_v32, %s3100_s8  ;;  %v648_v2 = vsel %vm492_vm1, %v643_v14, %v647_v15  ;;  %v654_v21 = vrot.slane %v652_v20, 1  ;;  %v222_v32 = vld [vmem:[%s3177_s28 + $0x30] sm:$0xe]  ;;  %v3690_v14 = vld [vmem:[%s3177_s28 + $0xa0] sm:$0xf]  ;;  %v2638_v20 = vcombine.low %v223_v62, %v3615_v47  ;;  %v782_v37 = vrot.slane %v3651_v56, 1 }
  0x91   : > { %v2637_v45 = vcombine.low %v222_v32, %v3580_v40  ;;  %v563_v46 = vrot.slane %v561_v43, 1  ;;  %v779_v40 = vrot.slane %v3602_v17, 1  ;;  %v802_v0 = vrot.slane %v2645_v44, 1  ;;  %v3726_v1 = vld [vmem:[%s3177_s28 + $0xa4] ss:$0 sps:$4 sm:$0x11]  }
  0x92   : > { %v2661_v5 = vcombine.low %v2497_v51, %v3690_v14  ;;  %v3742_v62 = vld [vmem:[%s3177_s28 + $0xb0] ss:$0 sps:$4 sm:$0x11]  }
  0x93   : > { %v3637_v63 = vpop.permute.xlu1 %830  ;;  %1732 = vrot.lane.b32.xlu1 %v1661_v52, %s3100_s8  ;;  %v655_v52 = vor.u32 %v654_v21, %v650_v35  ;;  %v778_v3 = vrot.slane %v2637_v45, 1  ;;  %v564_v15 = vsel %vm492_vm1, %v559_v58, %v563_v46  ;;  %v804_v22 = vsel %vm765_vm0, %v802_v0, %v803_v7  ;;  %v3748_v51 = vld [vmem:[%s3177_s28 + $0x50] ss:$0 sps:$4 sm:$0x11]  }
  0x94   : > { %1716 = vrot.lane.b32.xlu0 %v1565_v11, %s3100_s8  ;;  %v659_v11 = vrot.slane %v657_v30, 1  ;;  %v3714_v30 = vld [vmem:[%s3177_s28 + $0x4c] sm:$0xf]  ;;  %v781_v21 = vrot.slane %v2638_v20, 1  ;;  %v1153_v12 = vshll.u32 %v2661_v5, 16 }
  0x95   : > { %v3647_v4 = vpop.permute.xlu0 %814  ;;  %v780_v35 = vsel %vm765_vm0, %v778_v3, %v779_v40  ;;  %v2654_v19 = vcombine.low %v2483_v27, %v3714_v30 }
  0x96   : > { %v660_v9 = vsel %vm492_vm1, %v655_v52, %v659_v11  ;;  %v783_v56 = vsel %vm765_vm0, %v781_v21, %v782_v37  ;;  %v1155_v46 = vrot.slane %v1153_v12, 1  ;;  %v1074_v37 = vshll.u32 %v3748_v51, 16 }
  0x97   : > { %1858 = vrot.lane.b32.xlu1 %v1822_v39, %s3101_s9  ;;  %v2646_v39 = vcombine.low %v231_v59, %v3610_v42  ;;  %v2499_v42 = vld [vmem:[%s3177_s28 + $0xa8] sm:$0xf]  ;;  %v1069_v58 = vshll.u32 %v2654_v19, 16  ;;  %v1158_v59 = vshll.u32 %v3726_v1, 16  ;;  %v1067_v21 = vshrl.u32 %v2654_v19, 16 }
  0x98   : > { %v3655_v24 = vpop.permute.xlu1 %832  ;;  %1842 = vrot.lane.b32.xlu0 %v1798_v36, %s3101_s9  ;;  %v3698_v36 = vld [vmem:[%s3177_s28 + $0x40] sm:$0xf] }
  0x99   : > { %v805_v28 = vrot.slane %v2646_v39, 1  ;;  %v2653_v47 = vcombine.low %v2481_v33, %v3698_v36  ;;  %v1160_v20 = vrot.slane %v1158_v59, 1  ;;  %v2526_v59 = vld [vmem:[%s3177_s28 + $0x48] sm:$0xe] }
  0x9a   : > { %v3668_v55 = vpop.permute.xlu0 %816 }
  0x9b   : > { %709 = vrot.lane.b32.xlu1 %v648_v2, %s3096_s4  ;;  %v807_v43 = vsel %vm765_vm0, %v805_v28, %v806_v10  ;;  %v1057_v44 = vshll.u32 %v2653_v47, 16  ;;  %v1055_v7 = vshrl.u32 %v2653_v47, 16  ;;  %v1170_v28 = vshll.u32 %v3742_v62, 16  ;;  %v2525_v10 = vld [vmem:[%s3177_s28 + $0x3c] sm:$0xe] }
  0x9c   : > { %693 = vrot.lane.b32.xlu0 %v552_v13, %s3096_s4  ;;  %v2662_v13 = vcombine.low %v2499_v42, %v3706_v8 }
  0x9d   : > { %v3675_v54 = vpop.permute.xlu1 %687  ;;  %v1059_v40 = vrot.slane %v1057_v44, 1  ;;  %v3766_v44 = vld [vmem:[%s3177_s28 + $0xac] sm:$0xf] }
  0x9e   : > { %v3679_v60 = vpop.permute.xlu0 %685  ;;  %v1165_v11 = vshll.u32 %v2662_v13, 16  ;;  %v1163_v33 = vshrl.u32 %v2662_v13, 16 }
  0x9f   : > { %1860 = vrot.lane.b32.xlu1 %v1825_v48, %s3101_s9  ;;  %v3734_v48 = vld [vmem:[%s3177_s28 + $0x44] ss:$0 sps:$4 sm:$0x11]   ;;  %v1060_v42 = vor.u32 %v1059_v40, %v1055_v7  ;;  %v1076_v40 = vrot.slane %v1074_v37, 1 }
  0xa0   : > { %1844 = vrot.lane.b32.xlu0 %v1801_v34, %s3101_s9  ;;  %v1151_v34 = vshrl.u32 %v2661_v5, 16  ;;  %v1062_v3 = vshll.u32 %v3734_v48, 16  ;;  %v1291_v37 = vrot.slane %v3734_v48, 1 }
  0xa1   : > { %v3693_v17 = vpop.permute.xlu1 %703 }
  0xa2   : > { %v3700_v16 = vpop.permute.xlu0 %701  ;;  %v1156_v39 = vor.u32 %v1155_v46, %v1151_v34  ;;  %v1172_v46 = vrot.slane %v1170_v28, 1 }
  0xa3   : > { %711 = vrot.lane.b32.xlu1 %v660_v9, %s3096_s4 }
  0xa4   : > { %695 = vrot.lane.b32.xlu0 %v564_v15, %s3096_s4  ;;  %v2533_v15 = vld [vmem:[%s3177_s28 + $0x9c] sm:$0xe]  ;;  %v1161_v34 = vsel %vm492_vm1, %v1156_v39, %v1160_v20  ;;  %v3787_v39 = vld [vmem:[%s3177_s28 + $0xb8] sm:$0xf] }
  0xa5   : > { %v3716_v2 = vpop.permute.xlu1 %944 }
  0xa6   : > { %v3720_v32 = vpop.permute.xlu0 %928 }
  0xa7   : > { %838 = vrot.lane.b32.xlu1 %v804_v22, %s3095_s30  ;;  %v1167_v22 = vrot.slane %v1165_v11, 1  ;;  %v2534_v11 = vld [vmem:[%s3177_s28 + $0xa8] sm:$0xe] }
  0xa8   : > { %822 = vrot.lane.b32.xlu0 %v780_v35, %s3095_s30  ;;  %v1064_v35 = vrot.slane %v1062_v3, 1  ;;  %v2545_v3 = vld [vmem:[%s3177_s28 + $0x48] sm:$0xf] }
  0xa9   : > { %v3730_v45 = vpop.permute.xlu1 %1214 }
  0xaa   : > { %v3736_v52 = vpop.permute.xlu0 %1198 }
  0xab   : > { %840 = vrot.lane.b32.xlu1 %v807_v43, %s3095_s30  ;;  %v2561_v43 = vld [vmem:[%s3177_s28 + $0xa8] sm:$0xf] }
  0xac   : > { %824 = vrot.lane.b32.xlu0 %v783_v56, %s3095_s30  ;;  %v2685_v56 = vcombine.low %v2525_v10, %v3698_v36  ;;  %v3780_v36 = vcombine.low %v2561_v43, %v3766_v44  ;;  %v3783_v10 = vld [vmem:[%s3177_s28 + $0x4c] sm:$0xf] }
  0xad   : > { %v3744_v0 = vpop.permute.xlu1 %1216 }
  0xae   : > { %v3750_v9 = vpop.permute.xlu0 %1200 }
  0xaf   : > { %950 = vrot.lane.b32.xlu1 %v2661_v5, %s3094_s29  ;;  %v1071_v5 = vrot.slane %v1069_v58, 1  ;;  %v1168_v58 = vor.u32 %v1167_v22, %v1163_v33  ;;  %v2694_v33 = vcombine.low %v2534_v11, %v3706_v8  ;;  %v2686_v22 = vcombine.low %v2526_v59, %v3714_v30  ;;  %v3807_v30 = vld [vmem:[%s3177_s28 + $0x58] sm:$0xf]  ;;  %v3813_v11 = vld [vmem:[%s3177_s28 + $0xb0] ss:$0 sps:$4 sm:$0x11]  }
  0xb0   : > { %934 = vrot.lane.b32.xlu0 %v2653_v47, %s3094_s29  ;;  %v2693_v47 = vcombine.low %v2533_v15, %v3690_v14  ;;  %v1065_v14 = vsel %vm492_vm1, %v1060_v42, %v1064_v35  ;;  %v1315_v42 = vrot.slane %v3726_v1, 1  ;;  %v1290_v35 = vrot.slane %v2685_v56, 1  ;;  %v2547_v1 = vld [vmem:[%s3177_s28 + $0x54] sm:$0xf] }
  0xb1   : > { %v3757_v27 = vpop.permute.xlu1 %1342  ;;  %v1173_v28 = vsel %vm492_vm1, %v1168_v58, %v1172_v46  ;;  %v3800_v8 = vcombine.low %v2545_v3, %v3783_v10  ;;  %v1665_v56 = vshll.u32 %v3780_v36, 16  ;;  %v1318_v58 = vrot.slane %v3742_v62, 1 }
  0xb2   : > { %v3760_v12 = vpop.permute.xlu0 %1326  ;;  %v1314_v20 = vrot.slane %v2693_v47, 1  ;;  %v1293_v46 = vrot.slane %v2686_v22, 1  ;;  %v1294_v59 = vrot.slane %v3748_v51, 1  ;;  %v1292_v3 = vsel %vm765_vm0, %v1290_v35, %v1291_v37  ;;  %v3839_v35 = vld [vmem:[%s3177_s28 + $0x50] ss:$0 sps:$4 sm:$0x11]  }
  0xb3   : > { %952 = vrot.lane.b32.xlu1 %v2662_v13, %s3094_s29  ;;  %v1072_v13 = vor.u32 %v1071_v5, %v1067_v21  ;;  %v1663_v51 = vshrl.u32 %v3780_v36, 16  ;;  %v1888_v22 = vsel %vm1870_vm3, %v3209_v18, %v3700_v16  ;;  %v3849_v16 = vld [vmem:[%s3177_s28 + $0xbc] ss:$0 sps:$4 sm:$0x11]  }
  0xb4   : > { %936 = vrot.lane.b32.xlu0 %v2654_v19, %s3094_s29  ;;  %v2563_v19 = vld [vmem:[%s3177_s28 + $0xb4] sm:$0xf]  ;;  %v1316_v48 = vsel %vm765_vm0, %v1314_v20, %v1315_v42  ;;  %v1667_v20 = vrot.slane %v1665_v56, 1  ;;  %v1670_v42 = vshll.u32 %v3813_v11, 16 }
  0xb5   : > { %v3773_v7 = vpop.permute.xlu1 %1344  ;;  %v1077_v5 = vsel %vm492_vm1, %v1072_v13, %v1076_v40  ;;  %v3803_v47 = vcombine.low %v2563_v19, %v3787_v39  ;;  %v3822_v13 = vcombine.low %v2547_v1, %v3807_v30  ;;  %v1569_v19 = vshll.u32 %v3800_v8, 16 }
  0xb6   : > { %v3777_v15 = vpop.permute.xlu0 %1328  ;;  %v1295_v1 = vsel %vm765_vm0, %v1293_v46, %v1294_v59  ;;  %v3857_v46 = vld [vmem:[%s3177_s28 + $0x5c] ss:$0 sps:$4 sm:$0x11]  }
  0xb7   : > { %1222 = vrot.lane.b32.xlu1 %v1161_v34, %s3097_s5  ;;  %v1317_v34 = vrot.slane %v2694_v33, 1  ;;  %v1677_v33 = vshll.u32 %v3803_v47, 16  ;;  %v1581_v18 = vshll.u32 %v3822_v13, 16  ;;  %v1675_v6 = vshrl.u32 %v3803_v47, 16 }
  0xb8   : > { %1206 = vrot.lane.b32.xlu0 %v1065_v14, %s3097_s5  ;;  %v2597_v14 = vld [vmem:[%s3177_s28 + $0xa8] sm:$0xe]  ;;  %v1586_v57 = vshll.u32 %v3857_v46, 16 }
  0xb9   : > { %v3795_v21 = vpop.permute.xlu1 %1454  ;;  %v1319_v37 = vsel %vm765_vm0, %v1317_v34, %v1318_v58  ;;  %v1679_v61 = vrot.slane %v1677_v33, 1  ;;  %v1668_v34 = vor.u32 %v1667_v20, %v1663_v51  ;;  %v1672_v58 = vrot.slane %v1670_v42, 1  ;;  %v198_v20 = vld [vmem:[%s3177_s28 + $0xa8] sm:$0xf]  ;;  %v3869_v42 = vld [vmem:[%s3177_s28 + $0xac] sm:$0xf] }
  0xba   : > { %v3809_v43 = vpop.permute.xlu0 %1438  ;;  %v1682_v33 = vshll.u32 %v3849_v16, 16  ;;  %v1583_v51 = vrot.slane %v1581_v18, 1 }
  0xbb   : > { %1224 = vrot.lane.b32.xlu1 %v1173_v28, %s3097_s5  ;;  %v2741_v28 = vcombine.low %v2597_v14, %v3766_v44  ;;  %v1567_v44 = vshrl.u32 %v3800_v8, 16  ;;  %v1571_v14 = vrot.slane %v1569_v19, 1  ;;  %v1579_v19 = vshrl.u32 %v3822_v13, 16 }
  0xbc   : > { %1208 = vrot.lane.b32.xlu0 %v1077_v5, %s3097_s5  ;;  %v1872_v5 = vsel %vm1870_vm3, %v3214_v23, %v3679_v60  ;;  %v1921_v23 = vsel %vm1903_vm4, %v1888_v22, %v3637_v63  ;;  %v1673_v18 = vsel %vm492_vm1, %v1668_v34, %v1672_v58 }
  0xbd   : > { %v3824_v40 = vpop.permute.xlu1 %1456  ;;  %v1905_v59 = vsel %vm1903_vm4, %v1872_v5, %v3647_v4  ;;  %v1954_v4 = vsel %vm1936_vm5, %v1921_v23, %v3605_v41  ;;  %v1572_v5 = vor.u32 %v1571_v14, %v1567_v44  ;;  %v3875_v26 = vrot.slane %v2741_v28, 1  ;;  %v3887_v41 = vld [vmem:[%s3177_s28 + $0x4c] sm:$0xf] }
  0xbe   : > { %v3829_v62 = vpop.permute.xlu0 %1440  ;;  %v1584_v14 = vor.u32 %v1583_v51, %v1579_v19  ;;  %v3948_v51 = vld [vmem:[%s3177_s28 + $0xb8] sm:$0xf] }
  0xbf   : > { %1350 = vrot.lane.b32.xlu1 %v1316_v48, %s3098_s6  ;;  %v2589_v48 = vld [vmem:[%s3177_s28 + $0x48] sm:$0xe] }
  0xc0   : > { %1334 = vrot.lane.b32.xlu0 %v1292_v3, %s3098_s6  ;;  %v1574_v3 = vshll.u32 %v3839_v35, 16  ;;  %v2733_v63 = vcombine.low %v2589_v48, %v3783_v10  ;;  %v1938_v10 = vsel %vm1936_vm5, %v1905_v59, %v3619_v49  ;;  %v3896_v49 = vcombine.low %v198_v20, %v3869_v42 }
  0xc1   : > { %v1727_v56 = vpop.permute.xlu1 %1726 }
  0xc2   : > { %v1711_v60 = vpop.permute.xlu0 %1710 }
  0xc3   : > { %1352 = vrot.lane.b32.xlu1 %v1319_v37, %s3098_s6  ;;  %v1680_v37 = vor.u32 %v1679_v61, %v1675_v6  ;;  %v1971_v61 = vsel %vm1969_vm6, %v1938_v10, %v3736_v52  ;;  %v1684_v52 = vrot.slane %v1682_v33, 1  ;;  %v200_v33 = vld [vmem:[%s3177_s28 + $0xb4] sm:$0xf] }
  0xc4   : > { %1336 = vrot.lane.b32.xlu0 %v1295_v1, %s3098_s6  ;;  %v1987_v1 = vsel %vm1969_vm6, %v1954_v4, %v3730_v45  ;;  %v1576_v45 = vrot.slane %v1574_v3, 1  ;;  %v2004_v28 = vsel %vm2002_vm7, %v1971_v61, %v3760_v12  ;;  %v3911_v12 = vcombine.low %v182_v29, %v3887_v41 }
  0xc5   : > { %v3873_v22 = vpop.permute.xlu1 %1728  ;;  %v2020_v6 = vsel %vm2002_vm7, %v1987_v1, %v3757_v27  ;;  %v1890_v27 = vsel %vm1870_vm3, %v3221_v31, %v3693_v17  ;;  %v1588_v31 = vrot.slane %v1586_v57, 1  ;;  %v3919_v17 = vld [vmem:[%s3177_s28 + $0xb0] ss:$0 sps:$4 sm:$0x11]   ;;  %v1827_v29 = vrot.slane %v3813_v11, 1 }
  0xc6   : > { %v3881_v48 = vpop.permute.xlu0 %1712  ;;  %v2053_v44 = vsel %vm2035_vm8, %v2020_v6, %v3795_v21  ;;  %v1874_v21 = vsel %vm1870_vm3, %v3227_v38, %v3675_v54  ;;  %v1802_v38 = vrot.slane %v2733_v63, 1  ;;  %v664_v54 = vshll.u32 %v3896_v49, 16 }
  0xc7   : > { %1462 = vrot.lane.b32.xlu1 %v3780_v36, %s3099_s7  ;;  %v2037_v36 = vsel %vm2035_vm8, %v2004_v28, %v3809_v43  ;;  %v2086_v23 = vsel %vm2068_vm9, %v2053_v44, %v1727_v56  ;;  %v1923_v56 = vsel %vm1903_vm4, %v1890_v27, %v3655_v24  ;;  %v1577_v57 = vsel %vm492_vm1, %v1572_v5, %v1576_v45  ;;  %v184_v5 = vld [vmem:[%s3177_s28 + $0x54] sm:$0xf] }
  0xc8   : > { %1446 = vrot.lane.b32.xlu0 %v3800_v8, %s3099_s7  ;;  %v2070_v8 = vsel %vm2068_vm9, %v2037_v36, %v1711_v60  ;;  %v1803_v11 = vrot.slane %v3839_v35, 1  ;;  %v3936_v60 = vld [vmem:[%s3177_s28 + $0x50] ss:$0 sps:$4 sm:$0x11]   ;;  %v1956_v3 = vsel %vm1936_vm5, %v1923_v56, %v3716_v2  ;;  %v1907_v24 = vsel %vm1903_vm4, %v1874_v21, %v3668_v55  ;;  %v2598_v45 = vld [vmem:[%s3177_s28 + $0xb4] sm:$0xe] }
  0xc9   : > { %v1855_v34 = vpop.permute.xlu1 %1854  ;;  %v568_v63 = vshll.u32 %v3911_v12, 16  ;;  %v1940_v35 = vsel %vm1936_vm5, %v1907_v24, %v3720_v32  ;;  %v1989_v2 = vsel %vm1969_vm6, %v1956_v3, %v3744_v0  ;;  %v1589_v55 = vsel %vm492_vm1, %v1584_v14, %v1588_v31  ;;  %v2590_v28 = vld [vmem:[%s3177_s28 + $0x54] sm:$0xe] }
  0xca   : > { %v1839_v58 = vpop.permute.xlu0 %1838  ;;  %v2119_v59 = vsel %vm2101_vm10, %v2086_v23, %v1855_v34  ;;  %v669_v4 = vshll.u32 %v3919_v17, 16  ;;  %v1973_v1 = vsel %vm1969_vm6, %v1940_v35, %v3750_v9  ;;  %v2022_v10 = vsel %vm2002_vm7, %v1989_v2, %v3773_v7 }
  0xcb   : > { %1464 = vrot.lane.b32.xlu1 %v3803_v47, %s3099_s7  ;;  %v2103_v43 = vsel %vm2101_vm10, %v2070_v8, %v1839_v58  ;;  %2812 = vmatprep.mubr.msk.bf16.mxu1 %vm2161_vm11, %v2119_v59  ;;  %v1685_v47 = vsel %vm492_vm1, %v1680_v37, %v1684_v52  ;;  %v3960_v37 = vld [vmem:[%s3177_s28 + $0x58] sm:$0xf]  ;;  %v666_v32 = vrot.slane %v664_v54, 1  ;;  %v566_v0 = vshrl.u32 %v3911_v12, 16 }
  0xcc   : > { %1448 = vrot.lane.b32.xlu0 %v3822_v13, %s3099_s7  ;;  %2796 = vmatprep.mubr.msk.bf16.mxu0 %vm2161_vm11, %v2103_v43  ;;  %v662_v13 = vshrl.u32 %v3896_v49, 16  ;;  %v2006_v61 = vsel %vm2002_vm7, %v1973_v1, %v3777_v15  ;;  %v2055_v6 = vsel %vm2035_vm8, %v2022_v10, %v3824_v40  ;;  %v573_v9 = vshll.u32 %v3936_v60, 16  ;;  %v3999_v8 = vld [vmem:[%s3177_s28 + $0xbc] ss:$0 sps:$4 sm:$0x11]  }
  0xcd   : > { %v3942_v19 = vpop.permute.xlu1 %705  ;;  %v3977_v44 = vcombine.low %v200_v33, %v3948_v51  ;;  %v2039_v7 = vsel %vm2035_vm8, %v2006_v61, %v3829_v62  ;;  %v570_v15 = vrot.slane %v568_v63, 1  ;;  %v3984_v40 = vcombine.low %v184_v5, %v3960_v37  ;;  %v4006_v43 = vld [vmem:[%s3177_s28 + $0x5c] ss:$0 sps:$4 sm:$0x11]  }
  0xce   : > { %v3954_v20 = vpop.permute.xlu0 %689  ;;  %v2072_v14 = vsel %vm2068_vm9, %v2039_v7, %v3881_v48  ;;  %v2742_v23 = vcombine.low %v2598_v45, %v3787_v39  ;;  %v2734_v62 = vcombine.low %v2590_v28, %v3807_v30  ;;  %v667_v48 = vor.u32 %v666_v32, %v662_v13  ;;  %v233_v28 = vld [vmem:[%s3177_s28 + $0xb4] sm:$0xe] }
  0xcf   : > { %1734 = vrot.lane.b32.xlu1 %v1673_v18, %s3100_s8  ;;  %v2088_v18 = vsel %vm2068_vm9, %v2055_v6, %v3873_v22  ;;  %v1828_v22 = vsel %vm765_vm0, %v3875_v26, %v1827_v29  ;;  %v671_v21 = vrot.slane %v669_v4, 1  ;;  %v676_v39 = vshll.u32 %v3977_v44, 16  ;;  %v225_v7 = vld [vmem:[%s3177_s28 + $0x54] sm:$0xe] }
  0xd0   : > { %1718 = vrot.lane.b32.xlu0 %v1577_v57, %s3100_s8  ;;  %v1804_v58 = vsel %vm765_vm0, %v1802_v38, %v1803_v11  ;;  %v571_v59 = vor.u32 %v570_v15, %v566_v0  ;;  %v575_v31 = vrot.slane %v573_v9, 1  ;;  %v580_v54 = vshll.u32 %v3984_v40, 16 }
  0xd1   : > { %v1857_v52 = vpop.permute.xlu1 %1856  ;;  %v1829_v26 = vrot.slane %v2742_v23, 1  ;;  %v1830_v29 = vrot.slane %v3849_v16, 1  ;;  %v1805_v57 = vrot.slane %v2734_v62, 1  ;;  %v672_v38 = vsel %vm492_vm1, %v667_v48, %v671_v21  ;;  %v2501_v62 = vld [vmem:[%s3177_s28 + $0xb4] sm:$0xf] }
  0xd2   : > { %v2121_v27 = vsel %vm2101_vm10, %v2088_v18, %v1857_v52  ;;  %v1841_v36 = vpop.permute.xlu0 %1840  ;;  %v674_v11 = vshrl.u32 %v3977_v44, 16  ;;  %v678_v3 = vrot.slane %v676_v39, 1  ;;  %v681_v24 = vshll.u32 %v3999_v8, 16  ;;  %v2485_v48 = vld [vmem:[%s3177_s28 + $0x54] sm:$0xf] }
  0xd3   : > { %v2105_v34 = vsel %vm2101_vm10, %v2072_v14, %v1841_v36  ;;  %1736 = vrot.lane.b32.xlu1 %v1685_v47, %s3100_s8  ;;  %2813 = vmatmul.mubr.msk.bf16.vlgmr.msra.gmra.mxu1 %vm2161_vm11, %v2121_v27  ;;  %v1806_v47 = vrot.slane %v3857_v46, 1  ;;  %v576_v63 = vsel %vm492_vm1, %v571_v59, %v575_v31  ;;  %v578_v33 = vshrl.u32 %v3984_v40, 16  ;;  %v232_v46 = vld [vmem:[%s3177_s28 + $0xa8] sm:$0xe] }
  0xd4   : > { %1720 = vrot.lane.b32.xlu0 %v1589_v55, %s3100_s8  ;;  %2797 = vmatmul.mubr.msk.bf16.vlgmr.msra.gmra.mxu0 %vm2161_vm11, %v2105_v34  ;;  %v582_v35 = vrot.slane %v580_v54, 1  ;;  %v585_v16 = vshll.u32 %v4006_v43, 16  ;;  %v224_v55 = vld [vmem:[%s3177_s28 + $0x48] sm:$0xe]  ;;  %v1831_v4 = vsel %vm765_vm0, %v1829_v26, %v1830_v29  ;;  %v679_v5 = vor.u32 %v678_v3, %v674_v11  ;;  %v4051_v34 = vld [vmem:[%s3177_s28 + $0xb8] sm:$0xf] }
  0xd5   : > { %v4002_v30 = vpop.permute.xlu1 %707  ;;  %v683_v1 = vrot.slane %v681_v24, 1  ;;  %v2647_v10 = vcombine.low %v232_v46, %v3869_v42  ;;  %v1807_v0 = vsel %vm765_vm0, %v1805_v57, %v1806_v47  ;;  %v2639_v45 = vcombine.low %v224_v55, %v3887_v41  ;;  %v2503_v26 = vld [vmem:[%s3177_s28 + $0xc0] sm:$0xf]  ;;  %v4071_v29 = vld [vmem:[%s3177_s28 + $0xc4] sm:$0xf] }
  0xd6   : > { %v4009_v56 = vpop.permute.xlu0 %691  ;;  %v583_v61 = vor.u32 %v582_v35, %v578_v33  ;;  %v587_v6 = vrot.slane %v585_v16, 1  ;;  %v809_v52 = vrot.slane %v3919_v17, 1  ;;  %v2648_v15 = vcombine.low %v233_v28, %v3948_v51  ;;  %v4057_v17 = vld [vmem:[%s3177_s28 + $0x58] sm:$0xf]  ;;  %v2487_v47 = vld [vmem:[%s3177_s28 + $0x60] sm:$0xf] }
  0xd7   : > { %1862 = vrot.lane.b32.xlu1 %v1828_v22, %s3101_s9  ;;  %v684_v42 = vsel %vm492_vm1, %v679_v5, %v683_v1  ;;  %v808_v18 = vrot.slane %v2647_v10, 1  ;;  %v784_v27 = vrot.slane %v2639_v45, 1  ;;  %v785_v36 = vrot.slane %v3936_v60, 1  ;;  %v4087_v24 = vld [vmem:[%s3177_s28 + $0x5c] ss:$0 sps:$4 sm:$0x11]  }
  0xd8   : > { %1846 = vrot.lane.b32.xlu0 %v1804_v58, %s3101_s9  ;;  %v588_v41 = vsel %vm492_vm1, %v583_v61, %v587_v6  ;;  %v2640_v23 = vcombine.low %v225_v7, %v3960_v37  ;;  %v811_v51 = vrot.slane %v2648_v15, 1  ;;  %v812_v37 = vrot.slane %v3999_v8, 1  ;;  %v4081_v8 = vld [vmem:[%s3177_s28 + $0xbc] ss:$0 sps:$4 sm:$0x11]  }
  0xd9   : > { %v4018_v13 = vpop.permute.xlu1 %834  ;;  %v810_v60 = vsel %vm765_vm0, %v808_v18, %v809_v52  ;;  %v2663_v21 = vcombine.low %v2501_v62, %v4051_v34  ;;  %v786_v58 = vsel %vm765_vm0, %v784_v27, %v785_v36  ;;  %v788_v31 = vrot.slane %v4006_v43, 1  ;;  %v4100_v10 = vld [vmem:[%s3177_s28 + $0xc8] ss:$0 sps:$4 sm:$0x11]  }
  0xda   : > { %v4024_v2 = vpop.permute.xlu0 %818  ;;  %v787_v59 = vrot.slane %v2640_v23, 1  ;;  %v2655_v54 = vcombine.low %v2485_v48, %v4057_v17  ;;  %v813_v11 = vsel %vm765_vm0, %v811_v51, %v812_v37  ;;  %v2664_v43 = vcombine.low %v2503_v26, %v4071_v29  ;;  %v4105_v28 = vld [vmem:[%s3177_s28 + $0x68] ss:$0 sps:$4 sm:$0x11]   ;;  %v2535_v37 = vld [vmem:[%s3177_s28 + $0xb4] sm:$0xe] }
  0xdb   : > { %713 = vrot.lane.b32.xlu1 %v672_v38, %s3096_s4  ;;  %v4077_v38 = vld [vmem:[%s3177_s28 + $0x64] sm:$0xf]  ;;  %v1177_v3 = vshll.u32 %v2663_v21, 16  ;;  %v1175_v55 = vshrl.u32 %v2663_v21, 16  ;;  %v1086_v1 = vshll.u32 %v4087_v24, 16  ;;  %v1194_v36 = vshll.u32 %v4100_v10, 16 }
  0xdc   : > { %697 = vrot.lane.b32.xlu0 %v576_v63, %s3096_s4  ;;  %v789_v33 = vsel %vm765_vm0, %v787_v59, %v788_v31  ;;  %v2656_v35 = vcombine.low %v2487_v47, %v4077_v38  ;;  %v1081_v16 = vshll.u32 %v2655_v54, 16  ;;  %v1079_v6 = vshrl.u32 %v2655_v54, 16 }
  0xdd   : > { %v4031_v32 = vpop.permute.xlu1 %836  ;;  %v1179_v5 = vrot.slane %v1177_v3, 1  ;;  %v1187_v52 = vshrl.u32 %v2664_v43, 16  ;;  %v1098_v51 = vshll.u32 %v4105_v28, 16  ;;  %v2695_v26 = vcombine.low %v2535_v37, %v4051_v34 }
  0xde   : > { %v4036_v9 = vpop.permute.xlu0 %820  ;;  %v1083_v45 = vrot.slane %v1081_v16, 1  ;;  %v1093_v7 = vshll.u32 %v2656_v35, 16  ;;  %v1091_v48 = vshrl.u32 %v2656_v35, 16 }
  0xdf   : > { %1864 = vrot.lane.b32.xlu1 %v1831_v4, %s3101_s9  ;;  %v1182_v4 = vshll.u32 %v4081_v8, 16  ;;  %v1180_v15 = vor.u32 %v1179_v5, %v1175_v55  ;;  %v2536_v55 = vld [vmem:[%s3177_s28 + $0xc0] sm:$0xe]  ;;  %v1321_v5 = vrot.slane %v4081_v8, 1 }
  0xe0   : > { %1848 = vrot.lane.b32.xlu0 %v1807_v0, %s3101_s9  ;;  %v1189_v0 = vshll.u32 %v2664_v43, 16  ;;  %v1084_v62 = vor.u32 %v1083_v45, %v1079_v6 }
  0xe1   : > { %v4044_v14 = vpop.permute.xlu1 %946  ;;  %v1184_v18 = vrot.slane %v1182_v4, 1  ;;  %v1320_v4 = vrot.slane %v2695_v26, 1 }
  0xe2   : > { %v4053_v22 = vpop.permute.xlu0 %930  ;;  %v1191_v27 = vrot.slane %v1189_v0, 1  ;;  %v4138_v0 = vld [vmem:[%s3177_s28 + $0xc4] sm:$0xf] }
  0xe3   : > { %715 = vrot.lane.b32.xlu1 %v684_v42, %s3096_s4  ;;  %v1185_v59 = vsel %vm492_vm1, %v1180_v15, %v1184_v18  ;;  %v1297_v18 = vrot.slane %v4087_v24, 1  ;;  %v2549_v15 = vld [vmem:[%s3177_s28 + $0x60] sm:$0xf]  ;;  %v1322_v24 = vsel %vm765_vm0, %v1320_v4, %v1321_v5  ;;  %v4189_v4 = vld [vmem:[%s3177_s28 + $0xd4] ss:$0 sps:$4 sm:$0x11]  }
  0xe4   : > { %699 = vrot.lane.b32.xlu0 %v588_v41, %s3096_s4  ;;  %v1088_v41 = vrot.slane %v1086_v1, 1  ;;  %v1192_v31 = vor.u32 %v1191_v27, %v1187_v52  ;;  %v2696_v1 = vcombine.low %v2536_v55, %v4071_v29  ;;  %v2567_v27 = vld [vmem:[%s3177_s28 + $0xcc] sm:$0xf]  ;;  %s2770_s4 = sshll.u32 %s3145_s16, 12 }
  0xe5   : > { %v4064_v39 = vpop.permute.xlu1 %948 }
  0xe6   : > { %v4073_v57 = vpop.permute.xlu0 %932 }
  0xe7   : > { %842 = vrot.lane.b32.xlu1 %v810_v60, %s3095_s30  ;;  %v1095_v60 = vrot.slane %v1093_v7, 1 }
  0xe8   : > { %826 = vrot.lane.b32.xlu0 %v786_v58, %s3095_s30  ;;  %v2527_v58 = vld [vmem:[%s3177_s28 + $0x54] sm:$0xe] }
  0xe9   : > { %v4089_v63 = vpop.permute.xlu1 %1218  ;;  %v1096_v3 = vor.u32 %v1095_v60, %v1091_v48  ;;  %v2687_v16 = vcombine.low %v2527_v58, %v4057_v17  ;;  %v2565_v17 = vld [vmem:[%s3177_s28 + $0xc0] sm:$0xf]  ;;  %v4162_v60 = vld [vmem:[%s3177_s28 + $0xc8] ss:$0 sps:$4 sm:$0x11]  }
  0xea   : > { %v4093_v46 = vpop.permute.xlu0 %1202  ;;  %v2711_v29 = vcombine.low %v2565_v17, %v4138_v0 }
  0xeb   : > { %844 = vrot.lane.b32.xlu1 %v813_v11, %s3095_s30  ;;  %v1089_v11 = vsel %vm492_vm1, %v1084_v62, %v1088_v41  ;;  %v1296_v7 = vrot.slane %v2687_v16, 1  ;;  %v4147_v41 = vld [vmem:[%s3177_s28 + $0x64] sm:$0xf]  ;;  %v1324_v62 = vrot.slane %v4100_v10, 1  ;;  %v1694_v16 = vshll.u32 %v4162_v60, 16 }
  0xec   : > { %828 = vrot.lane.b32.xlu0 %v789_v33, %s3095_s30  ;;  %v1100_v33 = vrot.slane %v1098_v51, 1  ;;  %v2703_v48 = vcombine.low %v2549_v15, %v4147_v41  ;;  %v4178_v10 = vld [vmem:[%s3177_s28 + $0x68] ss:$0 sps:$4 sm:$0x11]  }
  0xed   : > { %v4102_v61 = vpop.permute.xlu1 %1220  ;;  %v1298_v37 = vsel %vm765_vm0, %v1296_v7, %v1297_v18  ;;  %v1598_v17 = vshll.u32 %v4178_v10, 16  ;;  %v1892_v7 = vsel %vm1870_vm3, %v3362_v50, %v3942_v19 }
  0xee   : > { %v4107_v42 = vpop.permute.xlu0 %1204  ;;  %v1101_v45 = vsel %vm492_vm1, %v1096_v3, %v1100_v33  ;;  %v1689_v3 = vshll.u32 %v2711_v29, 16 }
  0xef   : > { %954 = vrot.lane.b32.xlu1 %v2663_v21, %s3094_s29 }
  0xf0   : > { %938 = vrot.lane.b32.xlu0 %v2655_v54, %s3094_s29  ;;  %v1196_v54 = vrot.slane %v1194_v36, 1  ;;  %v4155_v36 = vld [vmem:[%s3177_s28 + $0xd0] sm:$0xf]  ;;  %v1691_v18 = vrot.slane %v1689_v3, 1  ;;  %v1600_v3 = vrot.slane %v1598_v17, 1 }
  0xf1   : > { %v4112_v23 = vpop.permute.xlu1 %1346  ;;  %v4172_v26 = vcombine.low %v2567_v27, %v4155_v36  ;;  %v1876_v27 = vsel %vm1870_vm3, %v3365_v53, %v3954_v20  ;;  %v1706_v53 = vshll.u32 %v4189_v4, 16 }
  0xf2   : > { %v4116_v21 = vpop.permute.xlu0 %1330  ;;  %v1197_v34 = vsel %vm492_vm1, %v1192_v31, %v1196_v54  ;;  %v2551_v31 = vld [vmem:[%s3177_s28 + $0x6c] sm:$0xf]  ;;  %v1909_v50 = vsel %vm1903_vm4, %v1876_v27, %v4024_v2 }
  0xf3   : > { %956 = vrot.lane.b32.xlu1 %v2664_v43, %s3094_s29  ;;  %v1699_v15 = vshrl.u32 %v4172_v26, 16 }
  0xf4   : > { %940 = vrot.lane.b32.xlu0 %v2656_v35, %s3094_s29  ;;  %v2528_v35 = vld [vmem:[%s3177_s28 + $0x60] sm:$0xe]  ;;  %s4403_s29 = scalar_lea.vmem [#allocation2], %s2471_s26 }
  0xf5   : > { %v4123_v47 = vpop.permute.xlu1 %1348  ;;  %v2688_v52 = vcombine.low %v2528_v35, %v4077_v38  ;;  %v1323_v38 = vrot.slane %v2696_v1, 1  ;;  %v1687_v1 = vshrl.u32 %v2711_v29, 16 }
  0xf6   : > { %v4128_v43 = vpop.permute.xlu0 %1332 }
  0xf7   : > { %1226 = vrot.lane.b32.xlu1 %v1185_v59, %s3097_s5  ;;  %v1299_v58 = vrot.slane %v2688_v52, 1  ;;  %v1300_v59 = vrot.slane %v4105_v28, 1  ;;  %v1325_v33 = vsel %vm765_vm0, %v1323_v38, %v1324_v62  ;;  %v1593_v28 = vshll.u32 %v2703_v48, 16 }
  0xf8   : > { %1210 = vrot.lane.b32.xlu0 %v1089_v11, %s3097_s5  ;;  %v4175_v11 = vld [vmem:[%s3177_s28 + $0x70] sm:$0xf]  ;;  %v1591_v52 = vshrl.u32 %v2703_v48, 16  ;;  %v1696_v38 = vrot.slane %v1694_v16, 1  ;;  %v1692_v16 = vor.u32 %v1691_v18, %v1687_v1 }
  0xf9   : > { %v4140_v6 = vpop.permute.xlu1 %1458  ;;  %v1301_v35 = vsel %vm765_vm0, %v1299_v58, %v1300_v59  ;;  %v1595_v62 = vrot.slane %v1593_v28, 1 }
  0xfa   : > { %v4149_v8 = vpop.permute.xlu0 %1442 }
  0xfb   : > { %1228 = vrot.lane.b32.xlu1 %v1197_v34, %s3097_s5  ;;  %v4186_v34 = vcombine.low %v2551_v31, %v4175_v11  ;;  %v1596_v17 = vor.u32 %v1595_v62, %v1591_v52  ;;  %v1894_v52 = vsel %vm1870_vm3, %v3400_v25, %v4002_v30 }
  0xfc   : > { %1212 = vrot.lane.b32.xlu0 %v1101_v45, %s3097_s5  ;;  %v1701_v45 = vshll.u32 %v4172_v26, 16  ;;  %s2405_s5 = sshll.u32 %s4403_s29, 4  ;;  %s4502_s5 = int_to_ptr.vmem [resolvable:$true] %s2405_s5 }
  0xfd   : > { %v4164_v51 = vpop.permute.xlu1 %1460  ;;  %v1605_v20 = vshll.u32 %v4186_v34, 16  ;;  %v1603_v28 = vshrl.u32 %v4186_v34, 16  ;;  %v1601_v25 = vsel %vm492_vm1, %v1596_v17, %v1600_v3  ;;  %p3039_p0 = scmp.lt.s32.totalorder %s4502_s5, %s3037_s11 }
  0xfe   : > { %v4169_v54 = vpop.permute.xlu0 %1444 }
  0xff   : > { %1354 = vrot.lane.b32.xlu1 %v1322_v24, %s3098_s6  ;;  %v1925_v24 = vsel %vm1903_vm4, %v1892_v7, %v4018_v13  ;;  %v1942_v13 = vsel %vm1936_vm5, %v1909_v50, %v4053_v22  ;;  %v1607_v7 = vrot.slane %v1605_v20, 1 }
 0x100   : > { %1338 = vrot.lane.b32.xlu0 %v1298_v37, %s3098_s6  ;;  %v4205_v37 = vld [vmem:[%s3177_s28 + $0x74] ss:$0 sps:$4 sm:$0x11]   ;;  %v1958_v19 = vsel %vm1936_vm5, %v1925_v24, %v4044_v14  ;;  %v1975_v2 = vsel %vm1969_vm6, %v1942_v13, %v4093_v46 }
 0x101   : > { %v1731_v55 = vpop.permute.xlu1 %1730  ;;  %v1991_v59 = vsel %vm1969_vm6, %v1958_v19, %v4089_v63  ;;  %v2008_v22 = vsel %vm2002_vm7, %v1975_v2, %v4116_v21  ;;  %v1610_v46 = vshll.u32 %v4205_v37, 16  ;;  %v2592_v19 = vld [vmem:[%s3177_s28 + $0x6c] sm:$0xe] }
 0x102   : > { %v1715_v5 = vpop.permute.xlu0 %1714  ;;  %v2024_v14 = vsel %vm2002_vm7, %v1991_v59, %v4112_v23  ;;  %v2041_v23 = vsel %vm2035_vm8, %v2008_v22, %v4149_v8  ;;  %v1812_v22 = vrot.slane %v4205_v37, 1 }
 0x103   : > { %1356 = vrot.lane.b32.xlu1 %v1325_v33, %s3098_s6  ;;  %v1703_v33 = vrot.slane %v1701_v45, 1  ;;  %v2057_v63 = vsel %vm2035_vm8, %v2024_v14, %v4140_v6  ;;  %v1708_v45 = vrot.slane %v1706_v53, 1  ;;  %v2074_v18 = vsel %vm2068_vm9, %v2041_v23, %v1715_v5  ;;  %v4567_v5 = vld [vmem:[#allocation5_spill] sm:$0xff] }
 0x104   : > { %1340 = vrot.lane.b32.xlu0 %v1301_v35, %s3098_s6  ;;  %v2599_v35 = vld [vmem:[%s3177_s28 + $0xc0] sm:$0xe]  ;;  %v1612_v30 = vrot.slane %v1610_v46, 1 }
 0x105   : > { %v4211_v58 = vpop.permute.xlu1 %1732  ;;  %v1704_v24 = vor.u32 %v1703_v33, %v1699_v15  ;;  %v2743_v6 = vcombine.low %v2599_v35, %v4138_v0  ;;  %v1878_v0 = vsel %vm1870_vm3, %v4567_v5, %v4009_v56  ;;  %v1927_v15 = vsel %vm1903_vm4, %v1894_v52, %v4031_v32  ;;  %v2600_v32 = vld [vmem:[%s3177_s28 + $0xcc] sm:$0xe] }
 0x106   : > { %v4219_v31 = vpop.permute.xlu0 %1716  ;;  %v1608_v56 = vor.u32 %v1607_v7, %v1603_v28  ;;  %v2744_v33 = vcombine.low %v2600_v32, %v4155_v36 }
 0x107   : > { %1466 = vrot.lane.b32.xlu1 %v2711_v29, %s3099_s7  ;;  %v2090_v29 = vsel %vm2068_vm9, %v2057_v63, %v1731_v55  ;;  %v1697_v55 = vsel %vm492_vm1, %v1692_v16, %v1696_v38  ;;  %v1960_v38 = vsel %vm1936_vm5, %v1927_v15, %v4064_v39  ;;  %v1832_v13 = vrot.slane %v2743_v6, 1 }
 0x108   : > { %1450 = vrot.lane.b32.xlu0 %v2703_v48, %s3099_s7  ;;  %v2591_v48 = vld [vmem:[%s3177_s28 + $0x60] sm:$0xe]  ;;  %v1993_v53 = vsel %vm1969_vm6, %v1960_v38, %v4102_v61  ;;  %v4568_v38 = vld [vmem:[#allocation6_spill] sm:$0xff] }
 0x109   : > { %v1859_v1 = vpop.permute.xlu1 %1858  ;;  %v2735_v50 = vcombine.low %v2591_v48, %v4147_v41  ;;  %v2026_v59 = vsel %vm2002_vm7, %v1993_v53, %v4123_v47  ;;  %v1833_v41 = vrot.slane %v4162_v60, 1 }
 0x10a   : > { %v2123_v21 = vsel %vm2101_vm10, %v2090_v29, %v1859_v1  ;;  %v1843_v27 = vpop.permute.xlu0 %1842  ;;  %v2059_v3 = vsel %vm2035_vm8, %v2026_v59, %v4164_v51 }
 0x10b   : > { %v2107_v8 = vsel %vm2101_vm10, %v2074_v18, %v1843_v27  ;;  %1468 = vrot.lane.b32.xlu1 %v4172_v26, %s3099_s7  ;;  %2816 = vmatprep.mubr.msk.bf16.mxu1 %vm2161_vm11, %v2123_v21  ;;  %v1911_v26 = vsel %vm1903_vm4, %v1878_v0, %v4036_v9  ;;  %v1709_v9 = vsel %vm492_vm1, %v1704_v24, %v1708_v45  ;;  %v1808_v14 = vrot.slane %v2735_v50, 1  ;;  %v4569_v50 = vld [vmem:[#allocation7_spill] sm:$0xff] }
 0x10c   : > { %1452 = vrot.lane.b32.xlu0 %v4186_v34, %s3099_s7  ;;  %2800 = vmatprep.mubr.msk.bf16.mxu0 %vm2161_vm11, %v2107_v8  ;;  %v1944_v34 = vsel %vm1936_vm5, %v1911_v26, %v4073_v57  ;;  %v1809_v57 = vrot.slane %v4178_v10, 1  ;;  %v2092_v60 = vsel %vm2068_vm9, %v2059_v3, %v4211_v58  ;;  %v1613_v10 = vsel %vm492_vm1, %v1608_v56, %v1612_v30  ;;  %s4497_s7 = scalar_lea.hbm %s4554_s3, %s2770_s4 }
 0x10d   : > { %v4262_v62 = vpop.permute.xlu1 %709  ;;  %v1977_v39 = vsel %vm1969_vm6, %v1944_v34, %v4107_v42  ;;  %v2736_v42 = vcombine.low %v2592_v19, %v4175_v11  ;;  %v1835_v11 = vrot.slane %v2744_v33, 1  ;;  %v1836_v58 = vrot.slane %v4189_v4, 1 }
 0x10e   : > { %v4271_v20 = vpop.permute.xlu0 %693  ;;  %v2010_v61 = vsel %vm2002_vm7, %v1977_v39, %v4128_v43  ;;  %v1896_v56 = vsel %vm1870_vm3, %v4568_v38, %v4262_v62 }
 0x10f   : > { %1738 = vrot.lane.b32.xlu1 %v1697_v55, %s3100_s8  ;;  %v2043_v47 = vsel %vm2035_vm8, %v2010_v61, %v4169_v54  ;;  %v1834_v54 = vsel %vm765_vm0, %v1832_v13, %v1833_v41  ;;  %v1811_v35 = vrot.slane %v2736_v42, 1  ;;  %v1837_v17 = vsel %vm765_vm0, %v1835_v11, %v1836_v58 }
 0x110   : > { %1722 = vrot.lane.b32.xlu0 %v1601_v25, %s3100_s8  ;;  %v2076_v43 = vsel %vm2068_vm9, %v2043_v47, %v4219_v31  ;;  %v1810_v31 = vsel %vm765_vm0, %v1808_v14, %v1809_v57  ;;  %v1880_v32 = vsel %vm1870_vm3, %v4569_v50, %v4271_v20 }
 0x111   : > { %v1861_v2 = vpop.permute.xlu1 %1860  ;;  %v1813_v23 = vsel %vm765_vm0, %v1811_v35, %v1812_v22 }
 0x112   : > { %v2125_v51 = vsel %vm2101_vm10, %v2092_v60, %v1861_v2  ;;  %v1845_v16 = vpop.permute.xlu0 %1844  ;;  %v4570_v2 = vld [vmem:[#allocation8_spill] sm:$0xff] }
 0x113   : > { %v2109_v36 = vsel %vm2101_vm10, %v2076_v43, %v1845_v16  ;;  %1740 = vrot.lane.b32.xlu1 %v1709_v9, %s3100_s8  ;;  %2817 = vmatmul.mubr.msk.bf16.gmra.mxu1 %vm2161_vm11, %v2125_v51  ;;  %v4571_v43 = vld [vmem:[#allocation9_spill] sm:$0xff] }
 0x114   : > { %1724 = vrot.lane.b32.xlu0 %v1613_v10, %s3100_s8  ;;  %2801 = vmatmul.mubr.msk.bf16.gmra.mxu0 %vm2161_vm11, %v2109_v36  ;;  %s4510_s8 = scalar_lea.sflag [#allocation3], %s161_s25 }
 0x115   : > { %v712_v28 = vpop.permute.xlu1 %711 }
 0x116   : > { %v696_v63 = vpop.permute.xlu0 %695  ;;  %v1898_v10 = vsel %vm1870_vm3, %v4570_v2, %v712_v28 }
 0x117   : > { %1866 = vrot.lane.b32.xlu1 %v1834_v54, %s3101_s9  ;;  %v1882_v51 = vsel %vm1870_vm3, %v4571_v43, %v696_v63 }
 0x118   : > { %1850 = vrot.lane.b32.xlu0 %v1810_v31, %s3101_s9 }
 0x119   : > { %v839_v46 = vpop.permute.xlu1 %838 }
 0x11a   : > { %v823_v29 = vpop.permute.xlu0 %822  ;;  %v1929_v19 = vsel %vm1903_vm4, %v1896_v56, %v839_v46 }
 0x11b   : > { %1868 = vrot.lane.b32.xlu1 %v1837_v17, %s3101_s9  ;;  %v1913_v34 = vsel %vm1903_vm4, %v1880_v32, %v823_v29 }
 0x11c   : > { %1852 = vrot.lane.b32.xlu0 %v1813_v23, %s3101_s9  ;;  %s3032_s9 = scalar_lea.vmem %s4502_s5, 4096 }
 0x11d   : > { %v841_v4 = vpop.permute.xlu1 %840  ;;  %p3033_p11 = scmp.ne.s32.totalorder %s4502_s5, %s3032_s9  ;;  %p3040_p1 = scmp.lt.s32.totalorder %s3038_s17, %s3032_s9 }
 0x11e   : > { %v825_v1 = vpop.permute.xlu0 %824  ;;  %v1931_v16 = vsel %vm1903_vm4, %v1898_v10, %v841_v4 }
 0x11f   : > { %v1915_v36 = vsel %vm1903_vm4, %v1882_v51, %v825_v1  ;;  %p3034_p12 = pnand %p3033_p11, %p3162_p5  ;;  %p3041_p2 = por %p3040_p1, %p3039_p0 }
 0x121   : > { %v951_v45 = vpop.permute.xlu1 %950  ;;  %p3035_p13 = pneg %p3034_p12 }
 0x122   : > { %v935_v7 = vpop.permute.xlu0 %934  ;;  %v1962_v53 = vsel %vm1936_vm5, %v1929_v19, %v951_v45 }
 0x123   : > { %v1946_v13 = vsel %vm1936_vm5, %v1913_v34, %v935_v7  ;;  %p3042_p3 = pnand %p3041_p2, %p3035_p13 }
 0x125   : > { %v953_v37 = vpop.permute.xlu1 %952 }
 0x126   : > { %v937_v18 = vpop.permute.xlu0 %936  ;;  %v1964_v54 = vsel %vm1936_vm5, %v1931_v16, %v953_v37 }
 0x127   : > { %v1948_v58 = vsel %vm1936_vm5, %v1915_v36, %v937_v18 }
 0x129   : > { %v1223_v21 = vpop.permute.xlu1 %1222 }
 0x12a   : > { %v1207_v27 = vpop.permute.xlu0 %1206  ;;  %v1995_v39 = vsel %vm1969_vm6, %v1962_v53, %v1223_v21 }
 0x12b   : > { %v1979_v41 = vsel %vm1969_vm6, %v1946_v13, %v1207_v27 }
 0x12d   : > { %v1225_v24 = vpop.permute.xlu1 %1224 }
 0x12e   : > { %v1209_v6 = vpop.permute.xlu0 %1208  ;;  %v1997_v28 = vsel %vm1969_vm6, %v1964_v54, %v1225_v24 }
 0x12f   : > { %v1981_v35 = vsel %vm1969_vm6, %v1948_v58, %v1209_v6 }
 0x131   : > { %v1351_v48 = vpop.permute.xlu1 %1350 }
 0x132   : > { %v1335_v52 = vpop.permute.xlu0 %1334  ;;  %v2028_v62 = vsel %vm2002_vm7, %v1995_v39, %v1351_v48 }
 0x133   : > { %v2012_v57 = vsel %vm2002_vm7, %v1979_v41, %v1335_v52 }
 0x135   : > { %v1353_v8 = vpop.permute.xlu1 %1352 }
 0x136   : > { %v1337_v55 = vpop.permute.xlu0 %1336  ;;  %v2030_v22 = vsel %vm2002_vm7, %v1997_v28, %v1353_v8 }
 0x137   : > { %v2014_v63 = vsel %vm2002_vm7, %v1981_v35, %v1337_v55 }
 0x139   : > { %v1463_v5 = vpop.permute.xlu1 %1462 }
 0x13a   : > { %v1447_v0 = vpop.permute.xlu0 %1446  ;;  %v2061_v20 = vsel %vm2035_vm8, %v2028_v62, %v1463_v5 }
 0x13b   : > { %v2045_v61 = vsel %vm2035_vm8, %v2012_v57, %v1447_v0 }
 0x13d   : > { %v1465_v15 = vpop.permute.xlu1 %1464 }
 0x13e   : > { %v1449_v25 = vpop.permute.xlu0 %1448  ;;  %v2063_v17 = vsel %vm2035_vm8, %v2030_v22, %v1465_v15 }
 0x13f   : > { %v2047_v46 = vsel %vm2035_vm8, %v2014_v63, %v1449_v25 }
 0x141   : > { %v1735_v30 = vpop.permute.xlu1 %1734 }
 0x142   : > { %v1719_v26 = vpop.permute.xlu0 %1718  ;;  %v2094_v3 = vsel %vm2068_vm9, %v2061_v20, %v1735_v30 }
 0x143   : > { %v2078_v42 = vsel %vm2068_vm9, %v2045_v61, %v1719_v26 }
 0x145   : > { %v1737_v9 = vpop.permute.xlu1 %1736 }
 0x146   : > { %v1721_v59 = vpop.permute.xlu0 %1720  ;;  %v2096_v23 = vsel %vm2068_vm9, %v2063_v17, %v1737_v9 }
 0x147   : > { %v2080_v4 = vsel %vm2068_vm9, %v2047_v46, %v1721_v59 }
 0x149   : > { %v1863_v33 = vpop.permute.xlu1 %1862 }
 0x14a   : > { %v2127_v47 = vsel %vm2101_vm10, %v2094_v3, %v1863_v33  ;;  %v1847_v60 = vpop.permute.xlu0 %1846 }
 0x14b   : > { %v2111_v14 = vsel %vm2101_vm10, %v2078_v42, %v1847_v60  ;;  %2820 = vmatprep.mubr.msk.bf16.mxu1 %vm2161_vm11, %v2127_v47 }
 0x14c   : > { %2804 = vmatprep.mubr.msk.bf16.mxu0 %vm2161_vm11, %v2111_v14 }
 0x14d   : > { %v714_v11 = vpop.permute.xlu1 %713 }
 0x14e   : > { %v698_v31 = vpop.permute.xlu0 %697  ;;  %v1900_v13 = vsel %vm1870_vm3, %v3896_v49, %v714_v11 }
 0x14f   : > { %v1884_v39 = vsel %vm1870_vm3, %v3911_v12, %v698_v31 }
 0x151   : > { %v1865_v29 = vpop.permute.xlu1 %1864 }
 0x152   : > { %v2129_v1 = vsel %vm2101_vm10, %v2096_v23, %v1865_v29  ;;  %v1849_v45 = vpop.permute.xlu0 %1848 }
 0x153   : > { %v2113_v7 = vsel %vm2101_vm10, %v2080_v4, %v1849_v45  ;;  %2821 = vmatmul.mubr.msk.bf16.gmra.mxu1 %vm2161_vm11, %v2129_v1  ;;  %v4399_v45 = vld [vmem:[%s4553_s2] ss:$0 sm:$0xff] }
 0x154   : > { %2805 = vmatmul.mubr.msk.bf16.gmra.mxu0 %vm2161_vm11, %v2113_v7 }
 0x155   : > { %v716_v37 = vpop.permute.xlu1 %715 }
 0x156   : > { %v700_v18 = vpop.permute.xlu0 %699  ;;  %v1902_v33 = vsel %vm1870_vm3, %v3977_v44, %v716_v37 }
 0x157   : > { %v1886_v12 = vsel %vm1870_vm3, %v3984_v40, %v700_v18 }
 0x159   : > { %v843_v21 = vpop.permute.xlu1 %842 }
 0x15a   : > { %v827_v27 = vpop.permute.xlu0 %826  ;;  %v1933_v59 = vsel %vm1903_vm4, %v1900_v13, %v843_v21 }
 0x15b   : > { %v1917_v41 = vsel %vm1903_vm4, %v1884_v39, %v827_v27 }
 0x15d   : > { %v845_v24 = vpop.permute.xlu1 %844 }
 0x15e   : > { %v829_v6 = vpop.permute.xlu0 %828  ;;  %v1935_v47 = vsel %vm1903_vm4, %v1902_v33, %v845_v24 }
 0x15f   : > { %v1919_v10 = vsel %vm1903_vm4, %v1886_v12, %v829_v6 }
 0x161   : > { %v955_v48 = vpop.permute.xlu1 %954 }
 0x162   : > { %v939_v52 = vpop.permute.xlu0 %938  ;;  %v1966_v62 = vsel %vm1936_vm5, %v1933_v59, %v955_v48 }
 0x163   : > { %v1950_v20 = vsel %vm1936_vm5, %v1917_v41, %v939_v52 }
 0x165   : > { %v957_v8 = vpop.permute.xlu1 %956 }
 0x166   : > { %v941_v55 = vpop.permute.xlu0 %940  ;;  %v1968_v14 = vsel %vm1936_vm5, %v1935_v47, %v957_v8 }
 0x167   : > { %v1952_v16 = vsel %vm1936_vm5, %v1919_v10, %v941_v55 }
 0x169   : > { %v1227_v5 = vpop.permute.xlu1 %1226 }
 0x16a   : > { %v1211_v0 = vpop.permute.xlu0 %1210  ;;  %v1999_v61 = vsel %vm1969_vm6, %v1966_v62, %v1227_v5 }
 0x16b   : > { %v1983_v49 = vsel %vm1969_vm6, %v1950_v20, %v1211_v0 }
 0x16d   : > { %v1229_v15 = vpop.permute.xlu1 %1228 }
 0x16e   : > { %v1213_v25 = vpop.permute.xlu0 %1212  ;;  %v2001_v40 = vsel %vm1969_vm6, %v1968_v14, %v1229_v15 }
 0x16f   : > { %v1985_v58 = vsel %vm1969_vm6, %v1952_v16, %v1213_v25 }
 0x171   : > { %v1355_v30 = vpop.permute.xlu1 %1354 }
 0x172   : > { %v1339_v26 = vpop.permute.xlu0 %1338  ;;  %v2032_v42 = vsel %vm2002_vm7, %v1999_v61, %v1355_v30 }
 0x173   : > { %v2016_v60 = vsel %vm2002_vm7, %v1983_v49, %v1339_v26 }
 0x175   : > { %v1357_v38 = vpop.permute.xlu1 %1356 }
 0x176   : > { %v1341_v56 = vpop.permute.xlu0 %1340  ;;  %v2034_v28 = vsel %vm2002_vm7, %v2001_v40, %v1357_v38 }
 0x177   : > { %v2018_v35 = vsel %vm2002_vm7, %v1985_v58, %v1341_v56 }
 0x179   : > { %v1467_v50 = vpop.permute.xlu1 %1466 }
 0x17a   : > { %v1451_v32 = vpop.permute.xlu0 %1450  ;;  %v2065_v2 = vsel %vm2035_vm8, %v2032_v42, %v1467_v50 }
 0x17b   : > { %v2049_v43 = vsel %vm2035_vm8, %v2016_v60, %v1451_v32 }
 0x17d   : > { %v1469_v19 = vpop.permute.xlu1 %1468 }
 0x17e   : > { %v1453_v34 = vpop.permute.xlu0 %1452  ;;  %v2067_v22 = vsel %vm2035_vm8, %v2034_v28, %v1469_v19 }
 0x17f   : > { %v2051_v63 = vsel %vm2035_vm8, %v2018_v35, %v1453_v34 }
 0x181   : > { %v1739_v53 = vpop.permute.xlu1 %1738 }
 0x182   : > { %v1723_v9 = vpop.permute.xlu0 %1722  ;;  %v2098_v44 = vsel %vm2068_vm9, %v2065_v2, %v1739_v53 }
 0x183   : > { %v2082_v36 = vsel %vm2068_vm9, %v2049_v43, %v1723_v9 }
 0x185   : > { %v1741_v57 = vpop.permute.xlu1 %1740 }
 0x186   : > { %v1725_v3 = vpop.permute.xlu0 %1724  ;;  %v2100_v17 = vsel %vm2068_vm9, %v2067_v22, %v1741_v57 }
 0x187   : > { %v2084_v23 = vsel %vm2068_vm9, %v2051_v63, %v1725_v3 }
 0x189   : > { %v1867_v51 = vpop.permute.xlu1 %1866 }
 0x18a   : > { %v2131_v54 = vsel %vm2101_vm10, %v2098_v44, %v1867_v51  ;;  %v1851_v11 = vpop.permute.xlu0 %1850 }
 0x18b   : > { %v2115_v31 = vsel %vm2101_vm10, %v2082_v36, %v1851_v11  ;;  %2824 = vmatprep.mubr.msk.bf16.mxu1 %vm2161_vm11, %v2131_v54 }
 0x18c   : > { %2808 = vmatprep.mubr.msk.bf16.mxu0 %vm2161_vm11, %v2115_v31 }
 0x18d   : > { %v1869_v46 = vpop.permute.xlu1 %1868 }
 0x18e   : > { %v2133_v29 = vsel %vm2101_vm10, %v2100_v17, %v1869_v46  ;;  %v1853_v4 = vpop.permute.xlu0 %1852 }
 0x18f   : > { %v2117_v1 = vsel %vm2101_vm10, %v2084_v23, %v1853_v4  ;;  %2825 = vmatmul.mubr.msk.bf16.gmra.mxu1 %vm2161_vm11, %v2133_v29 }
 0x190   : > { %2809 = vmatmul.mubr.msk.bf16.gmra.mxu0 %vm2161_vm11, %v2117_v1 }
 0x193   : > { %v2814_v7 = vpop.f32.mrf.mxu1 }
 0x194   : > { %v2798_v37 = vpop.f32.mrf.mxu0  ;;  %v2305_v18 = vadd.f32 %v2814_v7, %v4399_v45 }
 0x195   : > { %v2241_v21 = vadd.f32 %v2798_v37, %v4399_v45  ;;  %v2296_v27 = vpop.f32.mrf.mxu1 }
 0x196   : > { %2377 = vst.msk [vmem:[%s4403_s29 + $0x90] sm:$0xff] %vm2101_vm10, %v2305_v18  ;;  %v2232_v24 = vpop.f32.mrf.mxu0  ;;  %v2297_v6 = vadd.f32 %v4399_v45, %v2296_v27 }
 0x197   : > { %2361 = vst.msk [vmem:[%s4403_s29 + $0x10] sm:$0xff] %vm2101_vm10, %v2241_v21  ;;  %v2233_v48 = vadd.f32 %v4399_v45, %v2232_v24  ;;  %v2815_v52 = vpop.f32.mrf.mxu1 }
 0x198   : > { %2375 = vst.msk [vmem:[%s4403_s29 + $0x80] sm:$0xff] %vm2101_vm10, %v2297_v6  ;;  %v2799_v8 = vpop.f32.mrf.mxu0  ;;  %v2308_v55 = vadd.f32 %v2815_v52, %v4399_v45 }
 0x199   : > { %2359 = vst.msk [vmem:[%s4403_s29] sm:$0xff] %vm2101_vm10, %v2233_v48  ;;  %v2244_v5 = vadd.f32 %v2799_v8, %v4399_v45  ;;  %v2299_v0 = vpop.f32.mrf.mxu1 }
 0x19a   : > { %2378 = vst.msk [vmem:[%s4403_s29 + $0x98] sm:$0xff] %vm2101_vm10, %v2308_v55  ;;  %v2235_v15 = vpop.f32.mrf.mxu0  ;;  %v2300_v25 = vadd.f32 %v4399_v45, %v2299_v0 }
 0x19b   : > { %2362 = vst.msk [vmem:[%s4403_s29 + $0x18] sm:$0xff] %vm2101_vm10, %v2244_v5  ;;  %v2236_v30 = vadd.f32 %v4399_v45, %v2235_v15 }
 0x19c   : > { %2376 = vst.msk [vmem:[%s4403_s29 + $0x88] sm:$0xff] %vm2101_vm10, %v2300_v25 }
 0x19d   : > { %2360 = vst.msk [vmem:[%s4403_s29 + $0x8] sm:$0xff] %vm2101_vm10, %v2236_v30 }
 0x1d3   : > { %v2818_v26 = vpop.f32.mrf.mxu1 }
 0x1d4   : > { %v2802_v38 = vpop.f32.mrf.mxu0  ;;  %v2321_v56 = vadd.f32 %v2818_v26, %v4399_v45 }
 0x1d5   : > { %v2257_v50 = vadd.f32 %v2802_v38, %v4399_v45  ;;  %v2312_v32 = vpop.f32.mrf.mxu1 }
 0x1d6   : > { %2381 = vst.msk [vmem:[%s4403_s29 + $0xb0] sm:$0xff] %vm2101_vm10, %v2321_v56  ;;  %v2248_v19 = vpop.f32.mrf.mxu0  ;;  %v2313_v34 = vadd.f32 %v4399_v45, %v2312_v32 }
 0x1d7   : > { %2365 = vst.msk [vmem:[%s4403_s29 + $0x30] sm:$0xff] %vm2101_vm10, %v2257_v50  ;;  %v2249_v53 = vadd.f32 %v4399_v45, %v2248_v19  ;;  %v2819_v9 = vpop.f32.mrf.mxu1 }
 0x1d8   : > { %2379 = vst.msk [vmem:[%s4403_s29 + $0xa0] sm:$0xff] %vm2101_vm10, %v2313_v34  ;;  %v2803_v13 = vpop.f32.mrf.mxu0  ;;  %v2324_v39 = vadd.f32 %v2819_v9, %v4399_v45 }
 0x1d9   : > { %2363 = vst.msk [vmem:[%s4403_s29 + $0x20] sm:$0xff] %vm2101_vm10, %v2249_v53  ;;  %v2260_v59 = vadd.f32 %v2803_v13, %v4399_v45  ;;  %v2315_v41 = vpop.f32.mrf.mxu1 }
 0x1da   : > { %2382 = vst.msk [vmem:[%s4403_s29 + $0xb8] sm:$0xff] %vm2101_vm10, %v2324_v39  ;;  %v2251_v62 = vpop.f32.mrf.mxu0  ;;  %v2316_v57 = vadd.f32 %v4399_v45, %v2315_v41 }
 0x1db   : > { %2366 = vst.msk [vmem:[%s4403_s29 + $0x38] sm:$0xff] %vm2101_vm10, %v2260_v59  ;;  %v2252_v20 = vadd.f32 %v4399_v45, %v2251_v62 }
 0x1dc   : > { %2380 = vst.msk [vmem:[%s4403_s29 + $0xa8] sm:$0xff] %vm2101_vm10, %v2316_v57 }
 0x1dd   : > { %2364 = vst.msk [vmem:[%s4403_s29 + $0x28] sm:$0xff] %vm2101_vm10, %v2252_v20 }
 0x213   : > { %v2822_v61 = vpop.f32.mrf.mxu1 }
 0x214   : > { %v2806_v3 = vpop.f32.mrf.mxu0  ;;  %v2337_v33 = vadd.f32 %v2822_v61, %v4399_v45 }
 0x215   : > { %v2273_v49 = vadd.f32 %v2806_v3, %v4399_v45  ;;  %v2328_v42 = vpop.f32.mrf.mxu1 }
 0x216   : > { %2385 = vst.msk [vmem:[%s4403_s29 + $0xd0] sm:$0xff] %vm2101_vm10, %v2337_v33  ;;  %v2264_v12 = vpop.f32.mrf.mxu0  ;;  %v2329_v47 = vadd.f32 %v4399_v45, %v2328_v42 }
 0x217   : > { %2369 = vst.msk [vmem:[%s4403_s29 + $0x50] sm:$0xff] %vm2101_vm10, %v2273_v49  ;;  %v2265_v60 = vadd.f32 %v4399_v45, %v2264_v12  ;;  %v2823_v2 = vpop.f32.mrf.mxu1 }
 0x218   : > { %2383 = vst.msk [vmem:[%s4403_s29 + $0xc0] sm:$0xff] %vm2101_vm10, %v2329_v47  ;;  %v2807_v10 = vpop.f32.mrf.mxu0  ;;  %v2340_v14 = vadd.f32 %v2823_v2, %v4399_v45 }
 0x219   : > { %2367 = vst.msk [vmem:[%s4403_s29 + $0x40] sm:$0xff] %vm2101_vm10, %v2265_v60  ;;  %v2276_v43 = vadd.f32 %v2807_v10, %v4399_v45  ;;  %v2331_v44 = vpop.f32.mrf.mxu1 }
 0x21a   : > { %2386 = vst.msk [vmem:[%s4403_s29 + $0xd8] sm:$0xff] %vm2101_vm10, %v2340_v14  ;;  %v2267_v51 = vpop.f32.mrf.mxu0  ;;  %v2332_v16 = vadd.f32 %v4399_v45, %v2331_v44 }
 0x21b   : > { %2370 = vst.msk [vmem:[%s4403_s29 + $0x58] sm:$0xff] %vm2101_vm10, %v2276_v43  ;;  %v2268_v40 = vadd.f32 %v4399_v45, %v2267_v51 }
 0x21c   : > { %2384 = vst.msk [vmem:[%s4403_s29 + $0xc8] sm:$0xff] %vm2101_vm10, %v2332_v16 }
 0x21d   : > { %2368 = vst.msk [vmem:[%s4403_s29 + $0x48] sm:$0xff] %vm2101_vm10, %v2268_v40 }
 0x24f   : > { %v2826_v36 = vpop.f32.mrf.mxu1 }
 0x250   : > { %v2810_v54 = vpop.f32.mrf.mxu0  ;;  %v2353_v11 = vadd.f32 %v2826_v36, %v4399_v45 }
 0x251   : > { %v2289_v58 = vadd.f32 %v2810_v54, %v4399_v45  ;;  %v2344_v28 = vpop.f32.mrf.mxu1 }
 0x252   : > { %2389 = vst.msk [vmem:[%s4403_s29 + $0xf0] sm:$0xff] %vm2101_vm10, %v2353_v11  ;;  %v2280_v31 = vpop.f32.mrf.mxu0  ;;  %v2345_v35 = vadd.f32 %v4399_v45, %v2344_v28 }
 0x253   : > { %2373 = vst.msk [vmem:[%s4403_s29 + $0x70] sm:$0xff] %vm2101_vm10, %v2289_v58  ;;  %v2281_v22 = vadd.f32 %v4399_v45, %v2280_v31  ;;  %v2827_v63 = vpop.f32.mrf.mxu1 }
 0x254   : > { %2387 = vst.msk [vmem:[%s4403_s29 + $0xe0] sm:$0xff] %vm2101_vm10, %v2345_v35  ;;  %v2811_v17 = vpop.f32.mrf.mxu0  ;;  %v2356_v46 = vadd.f32 %v2827_v63, %v4399_v45 }
 0x255   : > { %2371 = vst.msk [vmem:[%s4403_s29 + $0x60] sm:$0xff] %vm2101_vm10, %v2281_v22  ;;  %v2292_v23 = vadd.f32 %v2811_v17, %v4399_v45  ;;  %v2347_v29 = vpop.f32.mrf.mxu1 }
 0x256   : > { %2390 = vst.msk [vmem:[%s4403_s29 + $0xf8] sm:$0xff] %vm2101_vm10, %v2356_v46  ;;  %v2283_v4 = vpop.f32.mrf.mxu0  ;;  %v2348_v1 = vadd.f32 %v4399_v45, %v2347_v29 }
 0x257   : > { %2374 = vst.msk [vmem:[%s4403_s29 + $0x78] sm:$0xff] %vm2101_vm10, %v2292_v23  ;;  %v2284_v7 = vadd.f32 %v4399_v45, %v2283_v4 }
 0x258   : > { %2388 = vst.msk [vmem:[%s4403_s29 + $0xe8] sm:$0xff] %vm2101_vm10, %v2348_v1 }
 0x259   : > { %2372 = vst.msk [vmem:[%s4403_s29 + $0x68] sm:$0xff] %vm2101_vm10, %v2284_v7 }
 0x25a   : > { %3045 = shalt.err (!%p3042_p3)
}
 0x25b   : > { %s3046_s19 = scalar_lea.hbm %s4497_s7, 4096  ;;  %s3050_s25 = scalar_lea.hbm %s4554_s3, 8192 }
 0x25c   : > { %p3047_p4 = scmp.ne.s32.totalorder %s4497_s7, %s3046_s19  ;;  %p3051_p9 = scmp.lt.s32.totalorder %s4497_s7, %s4554_s3 }
 0x25d   : > { %p3052_p10 = scmp.lt.s32.totalorder %s3050_s25, %s3046_s19 }
 0x25e   : > { %p3048_p7 = pnand %p3047_p4, %p3162_p5 }
 0x25f   : > { %p3053_p11 = por %p3052_p10, %p3051_p9 }
 0x260   : > { %p3049_p8 = pneg %p3048_p7 }
 0x262   : > { %p3054_p12 = pnand %p3053_p11, %p3049_p8 }
 0x264   : > { %3057 = shalt.err (!%p3054_p12)
}
 0x265   : > { %s3103_s28 = smov 128  }
 0x266   : > { %2837 = dma.vmem_to_hbm [thread:$0]  (%p3162_p5), %s4502_s5, 4096, %s4497_s7, %s4510_s8, %s3103_s28, %s3103_s28, %s3095_s30  }
 0x267 PF: > { %p2843_p13 = scmp.ge.s32.totalorder %s3092_s15, 2  ;;  %s2420_s29 = sand.u32 1, %s3080_s12  }
 0x268   : > { %s2421_s4 = scalar_lea.sflag [#allocation3], %s2420_s29 }
 0x269   : > { %p2840_p0 = pnand %p2843_p13, %p3166_p6 }
 0x26b   : > { %p2841_p1 = pneg %p2840_p0 }
 0x26d   : > { %3075 = dma.done.wait (%p2841_p1), %s2421_s4, 4096  }
 0x26e   : > { %3077 = vsyncadd (%p2841_p1), %s2421_s4, 4294963200  ;;  %p13_p2 = scmp.ge.s32.totalorder %s3149_s18, 4   ;;  %s4572_s12 = smov %s3084_s13 }
 0x26f   : > { %s4573_s13 = smov %s3088_s14  ;;  %s4574_s14 = smov %s3160_s21 }
 0x270   : > { %s4575_s15 = smov %s3149_s18  ;;  %15 = sbr.rel (!%p13_p2) target bundleno = 3 (0x3), region = 69 }
 0x275   :  { %2426 = vsyncpa [#allocation3], 1 }
 0x276   :  { %2428 = vsyncpa [#allocation3 + $0x1], 1 }

</bundles_post_ra>
